<compile_context>
chip_gen: v6e
topology: v6e:2x2x1
jax: 0.10.0
libtpu: 0.0.40
codegen_flags: <defaults>
</compile_context>

<pallas_src>
import jax
import jax.numpy as jnp
from jax import lax
from jax.experimental import pallas as pl
from jax.experimental.pallas import tpu as pltpu


_KP = 1024  # 1000-wide backbone feature dim, zero-padded to a multiple of 128


def _gelu_exact(x):
    # PyTorch nn.GELU() default: exact erf formulation.
    return 0.5 * x * (1.0 + lax.erf(x * jnp.float32(0.7071067811865476)))


# -----------------------------------------------------------------------------
# Fused kernel: backbone stubs + full head, one grid step = `bb` samples.
# -----------------------------------------------------------------------------
def conv_v1_kernel(x_ref, w_rx_ref, w_wr_ref, w1_ref, b1_ref, w2_ref, b2_ref,
                   w3_ref, b3_ref, out_ref, f_sc):
    bb = out_ref.shape[0]
    C = w_rx_ref.shape[0]
    HW = x_ref.shape[1] // C

    w_rx = w_rx_ref[...]                              # [C, KP]
    w_wr = w_wr_ref[...]                              # [C, KP]

    # Per-channel global average pool (static lane slices of the dense
    # [bb, C*HW] tile) fused with the backbone stub projections, which are C
    # unrolled VPU FMAs (K=3 would starve the MXU).
    acc1 = None
    acc2 = None
    for c in range(C):                                # static unroll
        pc = jnp.mean(x_ref[:, c * HW:(c + 1) * HW], axis=-1, keepdims=True)  # [bb,1]
        t1 = pc * w_rx[c:c + 1, :]                    # [bb, KP]
        t2 = pc * w_wr[c:c + 1, :]
        acc1 = t1 if acc1 is None else acc1 + t1
        acc2 = t2 if acc2 is None else acc2 + t2

    # Stack both branches in a VMEM scratch (no concatenate copy) so the shared
    # linear1 / linear2 weights hit the MXU once each.
    f_sc[0:bb, :] = acc1                              # resnext stub features
    f_sc[bb:2 * bb, :] = acc2                         # wide_resnet stub features

    h = jnp.dot(f_sc[...], w1_ref[...],
                preferred_element_type=jnp.float32)   # [2*bb, 512]
    # Per-branch linear1 bias (backbone bias pre-folded): row-iota select keeps
    # the branches stacked.
    row = lax.broadcasted_iota(jnp.int32, (2 * bb, 1), 0)
    h = _gelu_exact(h + jnp.where(row < bb, b1_ref[0:1, :], b1_ref[1:2, :]))
    h = _gelu_exact(jnp.dot(h, w2_ref[...],
                            preferred_element_type=jnp.float32)
                    + b2_ref[...])                    # [2*bb, 128]

    h1 = h[:bb]                                       # branch-1 hidden [bb, 128]
    h2 = h[bb:]                                       # branch-2 hidden [bb, 128]

    # linear3 (256 -> 1) as VPU multiply + lane reduction (no N=1 MXU matmul,
    # no concatenate copy).  b3 is a true scalar in SMEM.
    contrib = h1 * w3_ref[0:1, :] + h2 * w3_ref[1:2, :]               # [bb, 128]
    logits = jnp.sum(contrib, axis=-1, keepdims=True) + b3_ref[0]     # [bb, 1]
    out = jax.nn.sigmoid(logits)

    # Lane-dense (broadcast) store; wrapper reads column 0.
    out_ref[...] = jnp.broadcast_to(out, out_ref.shape)


# -----------------------------------------------------------------------------
# Tiling helper
# -----------------------------------------------------------------------------
def _pick_block_batch(B, C, HW):
    """Samples per grid step.

    - bb multiple of 8 (clean (8,128) tiling of the [bb, C*HW] block),
    - double-buffered x tile bounded by a ~20 MiB budget,
    - capped at 128 (stacked head matmul M = 2*bb = 256 fills the MXU),
    - >= 2 grid steps when B allows it, so v7x's 2 TensorCores both get work.
    """
    if B <= 8:
        # Block first dim equals the full batch dim -> always a legal tiling.
        # (Too few samples to split across v7x's two cores anyway.)
        return B
    row_bytes = C * HW * 4
    budget = 20 << 20                       # for the 2x double-buffered x tile
    cap = max(8, budget // (2 * row_bytes))
    bb = int(min(128, cap, B))
    bb = max(8, (bb // 8) * 8)
    if pl.cdiv(B, bb) < 2:                  # keep >= 2 parallel steps
        bb = max(8, (((B + 1) // 2 + 7) // 8) * 8)
    return bb


# -----------------------------------------------------------------------------
# Wrapper
# -----------------------------------------------------------------------------
def conv_v1_forward(x, params):
    # x: [B, 3, H, W] float32 (NCHW, like PyTorch).
    B, C, H, W = x.shape
    HW = H * W
    x2 = x.reshape(B, C * HW)               # sublane-dense, free view of NCHW

    w_rx, w_wr = params["w_rx"], params["w_wr"]       # [C, KP] (pre-padded)
    w1, b1 = params["w1"], params["b1"]               # [KP, 512], [2, 512]
    w2, b2 = params["w2"], params["b2"]               # [512, 128], [1, 128]
    w3, b3 = params["w3"], params["b3"]               # [2, 128], [1]

    bb = _pick_block_batch(B, C, HW)
    grid = (pl.cdiv(B, bb),)

    # Explicit VMEM budgeting: double-buffered x/out tiles, single-buffered
    # weights (Buffered(1)), stacked-feature scratch, headroom for
    # intermediates.  Raised above v5e's 16 MiB default when needed, capped
    # well inside v7x's 64 MiB physical VMEM.
    weight_bytes = 4 * (w_rx.size + w_wr.size + w1.size + b1.size
                        + w2.size + b2.size + w3.size)
    vmem_need = (2 * bb * C * HW * 4          # x tile, double-buffered
                 + 2 * bb * 128 * 4           # out tile, double-buffered
                 + weight_bytes
                 + 2 * bb * _KP * 4           # stacked-feature scratch
                 + (4 << 20))                 # intermediates + margin
    vmem_limit = int(min(max(vmem_need, 16 << 20), 48 << 20))

    flops = (4 * B * _KP * 512 + 4 * B * 512 * 128      # stacked head matmuls
             + 2 * B * C * HW                           # global average pool
             + 4 * B * C * _KP)                         # backbone stub FMAs
    transcendentals = 2 * B * (512 + 128) + B           # erf per GELU + sigmoid
    bytes_accessed = 4 * (x2.size + weight_bytes // 4 + b3.size + B * 128)

    const = lambda i: (0, 0)
    out = pl.pallas_call(
        conv_v1_kernel,
        out_shape=jax.ShapeDtypeStruct((B, 128), jnp.float32),
        grid=grid,
        in_specs=[
            pl.BlockSpec((bb, C * HW), lambda i: (i, 0)),                   # x
            pl.BlockSpec((C, _KP), const, pipeline_mode=pl.Buffered(1)),    # w_rx
            pl.BlockSpec((C, _KP), const, pipeline_mode=pl.Buffered(1)),    # w_wr
            pl.BlockSpec((_KP, 512), const, pipeline_mode=pl.Buffered(1)),  # w1
            pl.BlockSpec((2, 512), const, pipeline_mode=pl.Buffered(1)),    # b1 (per branch)
            pl.BlockSpec((512, 128), const, pipeline_mode=pl.Buffered(1)),  # w2
            pl.BlockSpec((1, 128), const, pipeline_mode=pl.Buffered(1)),    # b2
            pl.BlockSpec((2, 128), const, pipeline_mode=pl.Buffered(1)),    # w3 (two rows)
            pl.BlockSpec(memory_space=pltpu.MemorySpace.SMEM),              # b3 scalar
        ],
        out_specs=pl.BlockSpec((bb, 128), lambda i: (i, 0)),
        scratch_shapes=[pltpu.VMEM((2 * bb, _KP), jnp.float32)],
        compiler_params=pltpu.CompilerParams(
            dimension_semantics=("parallel",),
            vmem_limit_bytes=vmem_limit),
        cost_estimate=pl.CostEstimate(flops=flops,
                                      transcendentals=transcendentals,
                                      bytes_accessed=bytes_accessed),
    )(x2, w_rx, w_wr, w1, b1, w2, b2, w3, b3)

    # torch.squeeze on [B, 1] -> [B] (and 0-d when B == 1); already float32.
    return jnp.squeeze(out[:, :1])


# -----------------------------------------------------------------------------
# Parameters: raw (PyTorch-shaped) init + one-time kernel-ready preprocessing
# -----------------------------------------------------------------------------
def init_params(key, in_channels=3):
    ks = jax.random.split(key, 8)
    s = 0.02
    return {
        # Backbone stubs (stand-ins for resnext50_32x4d / wide_resnet50_2).
        "w_rx": s * jax.random.normal(ks[0], (in_channels, 1000), jnp.float32),
        "b_rx": s * jax.random.normal(ks[1], (1, 1000), jnp.float32),
        "w_wr": s * jax.random.normal(ks[2], (in_channels, 1000), jnp.float32),
        "b_wr": s * jax.random.normal(ks[3], (1, 1000), jnp.float32),
        # Head: linear1 (1000->512), linear2 (512->128), linear3 (256->1).
        "w1": s * jax.random.normal(ks[4], (1000, 512), jnp.float32),
        "b1": jnp.zeros((1, 512), jnp.float32),
        "w2": s * jax.random.normal(ks[5], (512, 128), jnp.float32),
        "b2": jnp.zeros((1, 128), jnp.float32),
        "w3": s * jax.random.normal(ks[6], (256, 1), jnp.float32),
        "b3": jnp.zeros((1, 1), jnp.float32),
    }


def prepare_params(raw):
    """One-time (init-time, NOT per-call) weight preprocessing:
      * zero-pad the 1000-wide feature dim to 1024 (exact: padded feature
        columns hit zero rows of w1),
      * fold the backbone-stub biases into per-branch linear1 biases
        (b1_branch = b1 + b_backbone @ w1, an exact linear transformation),
      * split linear3's 256-wide weight into two 128-lane rows following the
        torch.cat((hidden1, hidden2), 1) ordering,
      * flatten b3 to a true scalar for SMEM.
    """
    pad = _KP - raw["w_rx"].shape[1]
    b1_rx = raw["b1"] + raw["b_rx"] @ raw["w1"]       # [1, 512]
    b1_wr = raw["b1"] + raw["b_wr"] @ raw["w1"]       # [1, 512]
    return {
        "w_rx": jnp.pad(raw["w_rx"], ((0, 0), (0, pad))),      # [C, KP]
        "w_wr": jnp.pad(raw["w_wr"], ((0, 0), (0, pad))),      # [C, KP]
        "w1": jnp.pad(raw["w1"], ((0, pad), (0, 0))),          # [KP, 512]
        "b1": jnp.concatenate([b1_rx, b1_wr], axis=0),         # [2, 512]
        "w2": raw["w2"],                                       # [512, 128]
        "b2": raw["b2"],                                       # [1, 128]
        "w3": raw["w3"][:, 0].reshape(2, 128),                 # [2, 128]
        "b3": raw["b3"].reshape(1),                            # [1] (SMEM)
    }


# -----------------------------------------------------------------------------
# Main
# -----------------------------------------------------------------------------
if __name__ == "__main__":
    key = jax.random.PRNGKey(0)
    k_x, k_p = jax.random.split(key)

    # Small NCHW image batch: batch=2, channels=3 (RGB, as torchvision
    # backbones expect), spatial 16x16.
    x = jax.random.normal(k_x, (2, 3, 16, 16), jnp.float32)
    params = prepare_params(init_params(k_p))   # one-time weight prep

    out = jax.jit(conv_v1_forward)(x, params)
    out = jax.block_until_ready(out)

    assert out.shape == (2,) and out.dtype == jnp.float32
    assert bool(jnp.all((out >= 0.0) & (out <= 1.0)))
    print("KERNEL_OK")
</pallas_src>

<mosaic_0001>
module attributes {stable_mosaic.version = 11 : i64} {
  func.func @conv_v1_kernel(%arg0: i32, %arg1: memref<2x768xf32, #tpu.memory_space<vmem>>, %arg2: memref<3x1024xf32, #tpu.memory_space<vmem>>, %arg3: memref<3x1024xf32, #tpu.memory_space<vmem>>, %arg4: memref<1024x512xf32, #tpu.memory_space<vmem>>, %arg5: memref<2x512xf32, #tpu.memory_space<vmem>>, %arg6: memref<512x128xf32, #tpu.memory_space<vmem>>, %arg7: memref<1x128xf32, #tpu.memory_space<vmem>>, %arg8: memref<2x128xf32, #tpu.memory_space<vmem>>, %arg9: memref<1xf32, #tpu.memory_space<smem>>, %arg10: memref<2x128xf32, #tpu.memory_space<vmem>>, %arg11: memref<4x1024xf32, #tpu.memory_space<vmem>>) attributes {dimension_semantics = [#tpu.dimension_semantics<parallel>], iteration_bounds = array<i64: 1>, scalar_prefetch = 0 : i64, scratch_operands = 1 : i64, tpu.core_type = #tpu.core_type<tc>, window_params = [{transform_indices = @transform_0, window_bounds = array<i64: 2, 768>}, {pipeline_mode = #tpu.pipeline_mode<synchronous>, transform_indices = @transform_1, window_bounds = array<i64: 3, 1024>}, {pipeline_mode = #tpu.pipeline_mode<synchronous>, transform_indices = @transform_2, window_bounds = array<i64: 3, 1024>}, {pipeline_mode = #tpu.pipeline_mode<synchronous>, transform_indices = @transform_3, window_bounds = array<i64: 1024, 512>}, {pipeline_mode = #tpu.pipeline_mode<synchronous>, transform_indices = @transform_4, window_bounds = array<i64: 2, 512>}, {pipeline_mode = #tpu.pipeline_mode<synchronous>, transform_indices = @transform_5, window_bounds = array<i64: 512, 128>}, {pipeline_mode = #tpu.pipeline_mode<synchronous>, transform_indices = @transform_6, window_bounds = array<i64: 1, 128>}, {pipeline_mode = #tpu.pipeline_mode<synchronous>, transform_indices = @transform_7, window_bounds = array<i64: 2, 128>}, {transform_indices = @transform_8, window_bounds = array<i64: 1>}, {transform_indices = @transform_9, window_bounds = array<i64: 2, 128>}]} {
    %c0 = arith.constant 0 : index
    %c0_0 = arith.constant 0 : index
    %0 = vector.load %arg2[%c0, %c0_0] : memref<3x1024xf32, #tpu.memory_space<vmem>>, vector<3x1024xf32>
    %c0_1 = arith.constant 0 : index
    %c0_2 = arith.constant 0 : index
    %1 = vector.load %arg3[%c0_1, %c0_2] : memref<3x1024xf32, #tpu.memory_space<vmem>>, vector<3x1024xf32>
    %c0_3 = arith.constant 0 : index
    %c0_4 = arith.constant 0 : index
    %2 = vector.load %arg1[%c0_3, %c0_4] : memref<2x768xf32, #tpu.memory_space<vmem>>, vector<2x256xf32>
    %cst = arith.constant dense<0.000000e+00> : vector<2xf32>
    %3 = vector.multi_reduction <add>, %2, %cst [1] : vector<2x256xf32> to vector<2xf32>
    %4 = vector.shape_cast %3 : vector<2xf32> to vector<2x1xf32>
    %cst_5 = arith.constant 2.560000e+02 : f32
    %5 = vector.broadcast %cst_5 : f32 to vector<2x1xf32>
    %6 = arith.divf %4, %5 : vector<2x1xf32>
    %7 = vector.extract_strided_slice %0 {offsets = [0, 0], sizes = [1, 1024], strides = [1, 1]} : vector<3x1024xf32> to vector<1x1024xf32>
    %8 = vector.broadcast %6 : vector<2x1xf32> to vector<2x1024xf32>
    %9 = vector.broadcast %7 : vector<1x1024xf32> to vector<2x1024xf32>
    %10 = arith.mulf %8, %9 : vector<2x1024xf32>
    %11 = vector.extract_strided_slice %1 {offsets = [0, 0], sizes = [1, 1024], strides = [1, 1]} : vector<3x1024xf32> to vector<1x1024xf32>
    %12 = vector.broadcast %6 : vector<2x1xf32> to vector<2x1024xf32>
    %13 = vector.broadcast %11 : vector<1x1024xf32> to vector<2x1024xf32>
    %14 = arith.mulf %12, %13 : vector<2x1024xf32>
    %c0_6 = arith.constant 0 : index
    %c256 = arith.constant 256 : index
    %15 = vector.load %arg1[%c0_6, %c256] : memref<2x768xf32, #tpu.memory_space<vmem>>, vector<2x256xf32>
    %cst_7 = arith.constant dense<0.000000e+00> : vector<2xf32>
    %16 = vector.multi_reduction <add>, %15, %cst_7 [1] : vector<2x256xf32> to vector<2xf32>
    %17 = vector.shape_cast %16 : vector<2xf32> to vector<2x1xf32>
    %cst_8 = arith.constant 2.560000e+02 : f32
    %18 = vector.broadcast %cst_8 : f32 to vector<2x1xf32>
    %19 = arith.divf %17, %18 : vector<2x1xf32>
    %20 = vector.extract_strided_slice %0 {offsets = [1, 0], sizes = [1, 1024], strides = [1, 1]} : vector<3x1024xf32> to vector<1x1024xf32>
    %21 = vector.broadcast %19 : vector<2x1xf32> to vector<2x1024xf32>
    %22 = vector.broadcast %20 : vector<1x1024xf32> to vector<2x1024xf32>
    %23 = arith.mulf %21, %22 : vector<2x1024xf32>
    %24 = vector.extract_strided_slice %1 {offsets = [1, 0], sizes = [1, 1024], strides = [1, 1]} : vector<3x1024xf32> to vector<1x1024xf32>
    %25 = vector.broadcast %19 : vector<2x1xf32> to vector<2x1024xf32>
    %26 = vector.broadcast %24 : vector<1x1024xf32> to vector<2x1024xf32>
    %27 = arith.mulf %25, %26 : vector<2x1024xf32>
    %28 = arith.addf %10, %23 : vector<2x1024xf32>
    %29 = arith.addf %14, %27 : vector<2x1024xf32>
    %c0_9 = arith.constant 0 : index
    %c512 = arith.constant 512 : index
    %30 = vector.load %arg1[%c0_9, %c512] : memref<2x768xf32, #tpu.memory_space<vmem>>, vector<2x256xf32>
    %cst_10 = arith.constant dense<0.000000e+00> : vector<2xf32>
    %31 = vector.multi_reduction <add>, %30, %cst_10 [1] : vector<2x256xf32> to vector<2xf32>
    %32 = vector.shape_cast %31 : vector<2xf32> to vector<2x1xf32>
    %cst_11 = arith.constant 2.560000e+02 : f32
    %33 = vector.broadcast %cst_11 : f32 to vector<2x1xf32>
    %34 = arith.divf %32, %33 : vector<2x1xf32>
    %35 = vector.extract_strided_slice %0 {offsets = [2, 0], sizes = [1, 1024], strides = [1, 1]} : vector<3x1024xf32> to vector<1x1024xf32>
    %36 = vector.broadcast %34 : vector<2x1xf32> to vector<2x1024xf32>
    %37 = vector.broadcast %35 : vector<1x1024xf32> to vector<2x1024xf32>
    %38 = arith.mulf %36, %37 : vector<2x1024xf32>
    %39 = vector.extract_strided_slice %1 {offsets = [2, 0], sizes = [1, 1024], strides = [1, 1]} : vector<3x1024xf32> to vector<1x1024xf32>
    %40 = vector.broadcast %34 : vector<2x1xf32> to vector<2x1024xf32>
    %41 = vector.broadcast %39 : vector<1x1024xf32> to vector<2x1024xf32>
    %42 = arith.mulf %40, %41 : vector<2x1024xf32>
    %43 = arith.addf %28, %38 : vector<2x1024xf32>
    %44 = arith.addf %29, %42 : vector<2x1024xf32>
    %c0_12 = arith.constant 0 : index
    %c0_13 = arith.constant 0 : index
    %45 = vector.load %arg11[%c0_12, %c0_13] : memref<4x1024xf32, #tpu.memory_space<vmem>>, vector<2x1024xf32>
    tpu.vector_store %arg11[%c0_12, %c0_13], %43 {strides = array<i32>} : memref<4x1024xf32, #tpu.memory_space<vmem>>, vector<2x1024xf32>,
    %c2 = arith.constant 2 : index
    %c0_14 = arith.constant 0 : index
    %46 = vector.load %arg11[%c2, %c0_14] : memref<4x1024xf32, #tpu.memory_space<vmem>>, vector<2x1024xf32>
    tpu.vector_store %arg11[%c2, %c0_14], %44 {strides = array<i32>} : memref<4x1024xf32, #tpu.memory_space<vmem>>, vector<2x1024xf32>,
    %c0_15 = arith.constant 0 : index
    %c0_16 = arith.constant 0 : index
    %47 = vector.load %arg11[%c0_15, %c0_16] : memref<4x1024xf32, #tpu.memory_space<vmem>>, vector<4x1024xf32>
    %c0_17 = arith.constant 0 : index
    %c0_18 = arith.constant 0 : index
    %48 = vector.load %arg4[%c0_17, %c0_18] : memref<1024x512xf32, #tpu.memory_space<vmem>>, vector<1024x512xf32>
    %cst_19 = arith.constant dense<0.000000e+00> : vector<4x512xf32>
    %49 = tpu.matmul %47, %48, %cst_19 {dimension_numbers = #tpu.dot_dimension_numbers<[1], [0], [0], [1], [0, 0, 1, 1], [], []>} : vector<4x1024xf32>, vector<1024x512xf32>, vector<4x512xf32> -> vector<4x512xf32>
    %50 = tpu.iota {dimensions = array<i32: 0>} : vector<4x1xi32>
    %c2_i32 = arith.constant 2 : i32
    %51 = vector.broadcast %c2_i32 : i32 to vector<4x1xi32>
    %52 = arith.cmpi slt, %50, %51 : vector<4x1xi32>
    %c0_20 = arith.constant 0 : index
    %c0_21 = arith.constant 0 : index
    %53 = vector.load %arg5[%c0_20, %c0_21] : memref<2x512xf32, #tpu.memory_space<vmem>>, vector<1x512xf32>
    %c1 = arith.constant 1 : index
    %c0_22 = arith.constant 0 : index
    %54 = vector.load %arg5[%c1, %c0_22] : memref<2x512xf32, #tpu.memory_space<vmem>>, vector<1x512xf32>
    %55 = vector.shape_cast %52 : vector<4x1xi1> to vector<4x1xi1>
    %56 = vector.broadcast %55 : vector<4x1xi1> to vector<4x512xi1>
    %57 = vector.shape_cast %53 : vector<1x512xf32> to vector<1x512xf32>
    %58 = vector.broadcast %57 : vector<1x512xf32> to vector<4x512xf32>
    %59 = vector.shape_cast %54 : vector<1x512xf32> to vector<1x512xf32>
    %60 = vector.broadcast %59 : vector<1x512xf32> to vector<4x512xf32>
    %61 = arith.select %56, %58, %60 : vector<4x512xi1>, vector<4x512xf32>
    %62 = arith.addf %49, %61 : vector<4x512xf32>
    %cst_23 = arith.constant 5.000000e-01 : f32
    %63 = vector.broadcast %cst_23 : f32 to vector<4x512xf32>
    %64 = arith.mulf %63, %62 : vector<4x512xf32>
    %cst_24 = arith.constant 0.707106769 : f32
    %65 = vector.broadcast %cst_24 : f32 to vector<4x512xf32>
    %66 = arith.mulf %62, %65 : vector<4x512xf32>
    %67 = math.erf %66 : vector<4x512xf32>
    %cst_25 = arith.constant 1.000000e+00 : f32
    %68 = vector.broadcast %cst_25 : f32 to vector<4x512xf32>
    %69 = arith.addf %68, %67 : vector<4x512xf32>
    %70 = arith.mulf %64, %69 : vector<4x512xf32>
    %c0_26 = arith.constant 0 : index
    %c0_27 = arith.constant 0 : index
    %71 = vector.load %arg6[%c0_26, %c0_27] : memref<512x128xf32, #tpu.memory_space<vmem>>, vector<512x128xf32>
    %cst_28 = arith.constant dense<0.000000e+00> : vector<4x128xf32>
    %72 = tpu.matmul %70, %71, %cst_28 {dimension_numbers = #tpu.dot_dimension_numbers<[1], [0], [0], [1], [0, 0, 1, 1], [], []>} : vector<4x512xf32>, vector<512x128xf32>, vector<4x128xf32> -> vector<4x128xf32>
    %c0_29 = arith.constant 0 : index
    %c0_30 = arith.constant 0 : index
    %73 = vector.load %arg7[%c0_29, %c0_30] : memref<1x128xf32, #tpu.memory_space<vmem>>, vector<1x128xf32>
    %74 = vector.broadcast %73 : vector<1x128xf32> to vector<4x128xf32>
    %75 = arith.addf %72, %74 : vector<4x128xf32>
    %cst_31 = arith.constant 5.000000e-01 : f32
    %76 = vector.broadcast %cst_31 : f32 to vector<4x128xf32>
    %77 = arith.mulf %76, %75 : vector<4x128xf32>
    %cst_32 = arith.constant 0.707106769 : f32
    %78 = vector.broadcast %cst_32 : f32 to vector<4x128xf32>
    %79 = arith.mulf %75, %78 : vector<4x128xf32>
    %80 = math.erf %79 : vector<4x128xf32>
    %cst_33 = arith.constant 1.000000e+00 : f32
    %81 = vector.broadcast %cst_33 : f32 to vector<4x128xf32>
    %82 = arith.addf %81, %80 : vector<4x128xf32>
    %83 = arith.mulf %77, %82 : vector<4x128xf32>
    %84 = vector.extract_strided_slice %83 {offsets = [0, 0], sizes = [2, 128], strides = [1, 1]} : vector<4x128xf32> to vector<2x128xf32>
    %85 = vector.extract_strided_slice %83 {offsets = [2, 0], sizes = [2, 128], strides = [1, 1]} : vector<4x128xf32> to vector<2x128xf32>
    %c0_34 = arith.constant 0 : index
    %c0_35 = arith.constant 0 : index
    %86 = vector.load %arg8[%c0_34, %c0_35] : memref<2x128xf32, #tpu.memory_space<vmem>>, vector<1x128xf32>
    %87 = vector.broadcast %86 : vector<1x128xf32> to vector<2x128xf32>
    %88 = arith.mulf %84, %87 : vector<2x128xf32>
    %c1_36 = arith.constant 1 : index
    %c0_37 = arith.constant 0 : index
    %89 = vector.load %arg8[%c1_36, %c0_37] : memref<2x128xf32, #tpu.memory_space<vmem>>, vector<1x128xf32>
    %90 = vector.broadcast %89 : vector<1x128xf32> to vector<2x128xf32>
    %91 = arith.mulf %85, %90 : vector<2x128xf32>
    %92 = arith.addf %88, %91 : vector<2x128xf32>
    %cst_38 = arith.constant dense<0.000000e+00> : vector<2xf32>
    %93 = vector.multi_reduction <add>, %92, %cst_38 [1] : vector<2x128xf32> to vector<2xf32>
    %94 = vector.shape_cast %93 : vector<2xf32> to vector<2x1xf32>
    %c0_39 = arith.constant 0 : index
    %95 = memref.load %arg9[%c0_39] : memref<1xf32, #tpu.memory_space<smem>>
    %96 = vector.broadcast %95 : f32 to vector<2x1xf32>
    %97 = arith.addf %94, %96 : vector<2x1xf32>
    %98 = arith.negf %97 : vector<2x1xf32>
    %99 = math.exp %98 : vector<2x1xf32>
    %cst_40 = arith.constant 1.000000e+00 : f32
    %100 = vector.broadcast %cst_40 : f32 to vector<2x1xf32>
    %101 = arith.addf %100, %99 : vector<2x1xf32>
    %102 = arith.divf %100, %101 : vector<2x1xf32>
    %103 = vector.shape_cast %102 : vector<2x1xf32> to vector<2x1xf32>
    %104 = vector.broadcast %103 : vector<2x1xf32> to vector<2x128xf32>
    %c0_41 = arith.constant 0 : index
    %c0_42 = arith.constant 0 : index
    %105 = vector.load %arg10[%c0_41, %c0_42] : memref<2x128xf32, #tpu.memory_space<vmem>>, vector<2x128xf32>
    tpu.vector_store %arg10[%c0_41, %c0_42], %104 {strides = array<i32>} : memref<2x128xf32, #tpu.memory_space<vmem>>, vector<2x128xf32>,
    return
  }
  func.func @transform_0(%arg0: i32) -> (i32, i32) {
    %c0_i32 = arith.constant 0 : i32
    %c0_i32_0 = arith.constant 0 : i32
    return %arg0, %c0_i32 : i32, i32
  }
  func.func @transform_1(%arg0: i32) -> (i32, i32) {
    %c0_i32 = arith.constant 0 : i32
    %c0_i32_0 = arith.constant 0 : i32
    %c0_i32_1 = arith.constant 0 : i32
    return %c0_i32, %c0_i32_0 : i32, i32
  }
  func.func @transform_2(%arg0: i32) -> (i32, i32) {
    %c0_i32 = arith.constant 0 : i32
    %c0_i32_0 = arith.constant 0 : i32
    %c0_i32_1 = arith.constant 0 : i32
    return %c0_i32, %c0_i32_0 : i32, i32
  }
  func.func @transform_3(%arg0: i32) -> (i32, i32) {
    %c0_i32 = arith.constant 0 : i32
    %c0_i32_0 = arith.constant 0 : i32
    %c0_i32_1 = arith.constant 0 : i32
    return %c0_i32, %c0_i32_0 : i32, i32
  }
  func.func @transform_4(%arg0: i32) -> (i32, i32) {
    %c0_i32 = arith.constant 0 : i32
    %c0_i32_0 = arith.constant 0 : i32
    %c0_i32_1 = arith.constant 0 : i32
    return %c0_i32, %c0_i32_0 : i32, i32
  }
  func.func @transform_5(%arg0: i32) -> (i32, i32) {
    %c0_i32 = arith.constant 0 : i32
    %c0_i32_0 = arith.constant 0 : i32
    %c0_i32_1 = arith.constant 0 : i32
    return %c0_i32, %c0_i32_0 : i32, i32
  }
  func.func @transform_6(%arg0: i32) -> (i32, i32) {
    %c0_i32 = arith.constant 0 : i32
    %c0_i32_0 = arith.constant 0 : i32
    %c0_i32_1 = arith.constant 0 : i32
    return %c0_i32, %c0_i32_0 : i32, i32
  }
  func.func @transform_7(%arg0: i32) -> (i32, i32) {
    %c0_i32 = arith.constant 0 : i32
    %c0_i32_0 = arith.constant 0 : i32
    %c0_i32_1 = arith.constant 0 : i32
    return %c0_i32, %c0_i32_0 : i32, i32
  }
  func.func @transform_8(%arg0: i32) -> i32 {
    %c0_i32 = arith.constant 0 : i32
    %c0_i32_0 = arith.constant 0 : i32
    return %c0_i32 : i32
  }
  func.func @transform_9(%arg0: i32) -> (i32, i32) {
    %c0_i32 = arith.constant 0 : i32
    %c0_i32_0 = arith.constant 0 : i32
    return %arg0, %c0_i32 : i32, i32
  }
}

</mosaic_0001>

<bundles_post_ra>
// kernel: conv_v1_forward.1
= control target key start
LH: loop header
LB: loop body
LE: loop exit
PB: predicated region body
PF: predicated region fallthrough
CT: control target
= control target key end

     0   :  { %15 = vsyncpa [#allocation5], 0  ;;  %s2899_s0 = inlined_call_operand.vmem [shape: f32[2,768], index: 0, kind: input, shape index: {}]   ;;  %s2900_s1 = inlined_call_operand.hbm [shape: f32[3,1024], index: 1, kind: input, shape index: {}]   ;;  %s2901_s2 = inlined_call_operand.hbm [shape: f32[3,1024], index: 2, kind: input, shape index: {}]   ;;  %s2902_s3 = inlined_call_operand.hbm [shape: f32[1024,512], index: 3, kind: input, shape index: {}]   ;;  %s2903_s4 = inlined_call_operand.hbm [shape: f32[2,512], index: 4, kind: input, shape index: {}]   ;;  %s2904_s5 = inlined_call_operand.hbm [shape: f32[512,128], index: 5, kind: input, shape index: {}]   ;;  %s2905_s6 = inlined_call_operand.hbm [shape: f32[1,128], index: 6, kind: input, shape index: {}]   ;;  %s2906_s7 = inlined_call_operand.hbm [shape: f32[2,128], index: 7, kind: input, shape index: {}]   ;;  %s2907_s8 = inlined_call_operand.<no memory space> [shape: f32[1], index: 8, kind: input, shape index: {}]   ;;  %s2908_s9 = inlined_call_operand.vmem [shape: f32[2,128], index: 9, kind: output, shape index: {}]  }
   0x1   :  { %16 = vsyncpa [#allocation7], 0 }
   0x2   :  { %17 = vsyncpa [#allocation10], 0 }
   0x3   :  { %18 = vsyncpa [#allocation13], 0  ;;  %s2427_s30 = smov [#allocation6]   ;;  %s2428_s11 = smov [#allocation9]  }
   0x4   :  { %s37_s10 = sshll.u32 %s2427_s30, 4  ;;  %s59_s12 = sshll.u32 %s2428_s11, 4  ;;  %s38_s10 = int_to_ptr.vmem [resolvable:$true] %s37_s10  ;;  %s60_s12 = int_to_ptr.vmem [resolvable:$true] %s59_s12 }
   0x5   :  { %s2287_s13 = scalar_lea.vmem %s38_s10, 512  ;;  %p2292_p1 = scmp.lt.s32.totalorder %s38_s10, %s38_s10 }
   0x6   :  { %p2288_p0 = scmp.ne.s32.totalorder %s38_s10, %s2287_s13  ;;  %p2293_p2 = scmp.lt.s32.totalorder %s2287_s13, %s2287_s13 }
   0x8   :  { %p2294_p3 = por %p2293_p2, %p2292_p1 }
   0xa   :  { %p2295_p4 = pnand %p2294_p3, %p2288_p0 }
   0xc   :  { %2298 = shalt.err (!%p2295_p4)
}
   0xd   :  { %40 = dma.hbm_to_vmem [thread:$0]  %s2901_s2, 512, %s38_s10, [#allocation7]  }
   0xe   :  { %s2307_s16 = scalar_lea.vmem %s60_s12, 128  ;;  %p2312_p6 = scmp.lt.s32.totalorder %s60_s12, %s60_s12 }
   0xf   :  { %p2308_p5 = scmp.ne.s32.totalorder %s60_s12, %s2307_s16  ;;  %p2313_p7 = scmp.lt.s32.totalorder %s2307_s16, %s2307_s16 }
  0x11   :  { %p2314_p8 = por %p2313_p7, %p2312_p6 }
  0x13   :  { %p2315_p9 = pnand %p2314_p8, %p2308_p5 }
  0x15   :  { %2318 = shalt.err (!%p2315_p9)
}
  0x16   :  { %62 = dma.hbm_to_vmem [thread:$0]  %s2903_s4, 128, %s60_s12, [#allocation10]  }
  0x17   :  { %s2429_s19 = smov [#allocation12]   ;;  %s2430_s21 = smov [#allocation4]  }
  0x18   :  { %s81_s20 = sshll.u32 %s2429_s19, 4  ;;  %s27_s22 = sshll.u32 %s2430_s21, 4  ;;  %s82_s20 = int_to_ptr.vmem [resolvable:$true] %s81_s20  ;;  %s28_s22 = int_to_ptr.vmem [resolvable:$true] %s27_s22 }
  0x19   :  { %s2327_s23 = scalar_lea.vmem %s82_s20, 16  ;;  %s2331_s2 = scalar_lea.vmem %s82_s20, 32 }
  0x1a   :  { %p2328_p10 = scmp.ne.s32.totalorder %s82_s20, %s2327_s23  ;;  %p2332_p11 = scmp.lt.s32.totalorder %s82_s20, %s82_s20 }
  0x1b   :  { %p2333_p12 = scmp.lt.s32.totalorder %s2331_s2, %s2327_s23 }
  0x1d   :  { %p2334_p13 = por %p2333_p12, %p2332_p11 }
  0x1f   :  { %p2335_p0 = pnand %p2334_p13, %p2328_p10 }
  0x21   :  { %2338 = shalt.err (!%p2335_p0)
}
  0x22   :  { %84 = dma.hbm_to_vmem [thread:$0]  %s2905_s6, 16, %s82_s20, [#allocation13]  }
  0x23   :  { %s2347_s26 = scalar_lea.vmem %s28_s22, 512  ;;  %p2352_p2 = scmp.lt.s32.totalorder %s28_s22, %s28_s22 }
  0x24   :  { %p2348_p1 = scmp.ne.s32.totalorder %s28_s22, %s2347_s26  ;;  %p2353_p3 = scmp.lt.s32.totalorder %s2347_s26, %s2347_s26 }
  0x26   :  { %p2354_p4 = por %p2353_p3, %p2352_p2 }
  0x28   :  { %p2355_p5 = pnand %p2354_p4, %p2348_p1 }
  0x2a   :  { %2358 = shalt.err (!%p2355_p5)
}
  0x2b   :  { %30 = dma.hbm_to_vmem [thread:$0]  %s2900_s1, 512, %s28_s22, [#allocation5]  }
  0x2c   :  { %s2431_s28 = smov [#allocation8]  }
  0x2d   :  { %s46_s29 = sshll.u32 %s2431_s28, 4  ;;  %s47_s29 = int_to_ptr.vmem [resolvable:$true] %s46_s29 }
  0x2e   :  { %s2367_s30 = scalar_lea.vmem %s47_s29, 65536  ;;  %p2372_p7 = scmp.lt.s32.totalorder %s47_s29, %s47_s29 }
  0x2f   :  { %p2368_p6 = scmp.ne.s32.totalorder %s47_s29, %s2367_s30  ;;  %p2373_p8 = scmp.lt.s32.totalorder %s2367_s30, %s2367_s30 }
  0x31   :  { %p2374_p9 = por %p2373_p8, %p2372_p7 }
  0x33   :  { %p2375_p10 = pnand %p2374_p9, %p2368_p6 }
  0x35   :  { %2378 = shalt.err (!%p2375_p10)
}
  0x36   :  { %s2432_s6 = smov 512   ;;  %s2433_s10 = smov 32  }
  0x37   :  { %52 = dma.hbm_to_vmem [thread:$0]  %s2902_s3, 65536, %s47_s29, [#allocation7], %s2432_s6, %s2432_s6, %s2433_s10  }
  0x38   :  { %s2434_s13 = smov [#allocation11]  }
  0x39   :  { %s68_s14 = sshll.u32 %s2434_s13, 4  ;;  %s69_s14 = int_to_ptr.vmem [resolvable:$true] %s68_s14 }
  0x3a   :  { %s2387_s1 = scalar_lea.vmem %s69_s14, 8192  ;;  %p2392_p12 = scmp.lt.s32.totalorder %s69_s14, %s69_s14 }
  0x3b   :  { %p2388_p11 = scmp.ne.s32.totalorder %s69_s14, %s2387_s1  ;;  %p2393_p13 = scmp.lt.s32.totalorder %s2387_s1, %s2387_s1 }
  0x3d   :  { %p2394_p0 = por %p2393_p13, %p2392_p12 }
  0x3f   :  { %p2395_p1 = pnand %p2394_p0, %p2388_p11 }
  0x41   :  { %2398 = shalt.err (!%p2395_p1)
}
  0x42   :  { %s2435_s15 = smov 128   ;;  %s2436_s16 = smov 8  }
  0x43   :  { %74 = dma.hbm_to_vmem [thread:$0]  %s2904_s5, 8192, %s69_s14, [#allocation10], %s2435_s15, %s2435_s15, %s2436_s16  }
  0x44   :  { %s2437_s19 = smov [#allocation14]  }
  0x45   :  { %s91_s20 = sshll.u32 %s2437_s19, 4  ;;  %s92_s20 = int_to_ptr.vmem [resolvable:$true] %s91_s20 }
  0x46   :  { %s2407_s3 = scalar_lea.vmem %s92_s20, 32  ;;  %p2412_p3 = scmp.lt.s32.totalorder %s92_s20, %s92_s20 }
  0x47   :  { %p2408_p2 = scmp.ne.s32.totalorder %s92_s20, %s2407_s3  ;;  %p2413_p4 = scmp.lt.s32.totalorder %s2407_s3, %s2407_s3 }
  0x49   :  { %p2414_p5 = por %p2413_p4, %p2412_p3 }
  0x4b   :  { %p2415_p6 = pnand %p2414_p5, %p2408_p2 }
  0x4d   :  { %2418 = shalt.err (!%p2415_p6)
}
  0x4e   :  { %94 = dma.hbm_to_vmem [thread:$0]  %s2906_s7, 32, %s92_s20, [#allocation13]  }
  0x4f   :  { %2419 = dma.done.wait [#allocation5], 512  }
  0x50   :  { %2420 = vsyncadd [#allocation5], 4294966784 }
  0x51   :  { %2421 = dma.done.wait [#allocation7], 66048  }
  0x52   :  { %2422 = vsyncadd [#allocation7], 4294901248 }
  0x53   :  { %2423 = dma.done.wait [#allocation10], 8320  }
  0x54   :  { %2424 = vsyncadd [#allocation10], 4294958976 }
  0x55   :  { %2425 = dma.done.wait [#allocation13], 48  }
  0x56   :  { %2426 = vsyncadd [#allocation13], 4294967248  ;;  %vm138_vm0 = vcmask 1041408   ;;  %v811_v1 = vld [vmem:[#allocation8 + $0x1e8] sm:$0xff]  ;;  %v810_v6 = vld [vmem:[#allocation8 + $0x1e0] sm:$0xff] }
  0x57   :  { %v2169_v0 = vld.sshfl [vmem:[%s2899_s0] sm:$0x33 pattern:$0x76325410]  ;;  %v939_v2 = vld [vmem:[#allocation8 + $0x5e8] sm:$0xff]  ;;  %1328 = vmatprep.subr.mxu0 %v811_v1 }
  0x58   :  { %v135_v3 = vcombine.high %v2169_v0, %v2169_v0  ;;  %v139_v4 = vsel %vm138_vm0, %v2169_v0, 0.0  ;;  %v2170_v5 = vld.sshfl [vmem:[%s2899_s0 + $0x4] sm:$0x33 pattern:$0x76325410]  ;;  %1399 = vmatprep.subr.mxu1 %v939_v2  ;;  %1329 = vmatpush1.msra.mxu0 %v810_v6  ;;  %v807_v14 = vld [vmem:[#allocation8 + $0x1c8] sm:$0xff] }
  0x59   :  { %v323_v7 = vcombine.high %v2170_v5, %v2170_v5  ;;  %v2171_v8 = vld.sshfl [vmem:[%s2899_s0 + $0x8] sm:$0x33 pattern:$0x76325410]  ;;  %v938_v9 = vld [vmem:[#allocation8 + $0x5e0] sm:$0xff]  ;;  %v326_v11 = vsel %vm138_vm0, %v2170_v5, 0.0  ;;  %1330 = vmatprep.subr.mxu0 %v807_v14 }
  0x5a   :  { %v140_v10 = vsel %vm138_vm0, %v135_v3, 0.0  ;;  %v517_v12 = vcombine.high %v2171_v8, %v2171_v8  ;;  %v520_v13 = vsel %vm138_vm0, %v2171_v8, 0.0  ;;  %1400 = vmatpush1.msra.mxu1 %v938_v9  ;;  %v935_v15 = vld [vmem:[#allocation8 + $0x5c8] sm:$0xff]  ;;  %v806_v16 = vld [vmem:[#allocation8 + $0x1c0] sm:$0xff] }
  0x5b   :  { %v141_v17 = vadd.f32 %v140_v10, %v139_v4  ;;  %v327_v18 = vsel %vm138_vm0, %v323_v7, 0.0  ;;  %1401 = vmatprep.subr.mxu1 %v935_v15  ;;  %v934_v19 = vld [vmem:[#allocation8 + $0x5c0] sm:$0xff]  ;;  %v803_v20 = vld [vmem:[#allocation8 + $0x1a8] sm:$0xff]  ;;  %1331 = vmatpush1.msra.mxu0 %v806_v16 }
  0x5c   :  { %v931_v21 = vld [vmem:[#allocation8 + $0x5a8] sm:$0xff]  ;;  %v521_v22 = vsel %vm138_vm0, %v517_v12, 0.0  ;;  %1402 = vmatpush1.msra.mxu1 %v934_v19  ;;  %v802_v23 = vld [vmem:[#allocation8 + $0x1a0] sm:$0xff]  ;;  %v328_v25 = vadd.f32 %v327_v18, %v326_v11  ;;  %1332 = vmatprep.subr.mxu0 %v803_v20 }
  0x5d   :  { %v930_v24 = vld [vmem:[#allocation8 + $0x5a0] sm:$0xff]  ;;  %142 = vadd.xlane.f32.xlu0 %v141_v17  ;;  %v522_v26 = vadd.f32 %v521_v22, %v520_v13  ;;  %v799_v27 = vld [vmem:[#allocation8 + $0x188] sm:$0xff]  ;;  %1403 = vmatprep.subr.mxu1 %v931_v21 }
  0x5e   :  { %v927_v28 = vld [vmem:[#allocation8 + $0x588] sm:$0xff]  ;;  %1333 = vmatpush1.msra.mxu0 %v802_v23  ;;  %v798_v29 = vld [vmem:[#allocation8 + $0x180] sm:$0xff]  ;;  %1404 = vmatpush1.msra.mxu1 %v930_v24 }
  0x5f   :  { %523 = vadd.xlane.f32.xlu1 %v522_v26  ;;  %v926_v30 = vld [vmem:[#allocation8 + $0x580] sm:$0xff]  ;;  %v795_v31 = vld [vmem:[#allocation8 + $0x168] sm:$0xff]  ;;  %1334 = vmatprep.subr.mxu0 %v799_v27 }
  0x60   :  { %1405 = vmatprep.subr.mxu1 %v927_v28  ;;  %v923_v32 = vld [vmem:[#allocation8 + $0x568] sm:$0xff]  ;;  %v794_v33 = vld [vmem:[#allocation8 + $0x160] sm:$0xff]  ;;  %1335 = vmatpush1.msra.mxu0 %v798_v29 }
  0x61   :  { %329 = vadd.xlane.f32.xlu0 %v328_v25  ;;  %v922_v34 = vld [vmem:[#allocation8 + $0x560] sm:$0xff]  ;;  %v791_v35 = vld [vmem:[#allocation8 + $0x148] sm:$0xff]  ;;  %1406 = vmatpush1.msra.mxu1 %v926_v30 }
  0x62   :  { %1336 = vmatprep.subr.mxu0 %v795_v31  ;;  %v919_v36 = vld [vmem:[#allocation8 + $0x548] sm:$0xff]  ;;  %v790_v37 = vld [vmem:[#allocation8 + $0x140] sm:$0xff]  ;;  %1407 = vmatprep.subr.mxu1 %v923_v32 }
  0x63   :  { %1337 = vmatpush1.msra.mxu0 %v794_v33  ;;  %v918_v38 = vld [vmem:[#allocation8 + $0x540] sm:$0xff]  ;;  %v787_v39 = vld [vmem:[#allocation8 + $0x128] sm:$0xff]  ;;  %1408 = vmatpush1.msra.mxu1 %v922_v34 }
  0x64   :  { %1338 = vmatprep.subr.mxu0 %v791_v35  ;;  %v915_v40 = vld [vmem:[#allocation8 + $0x528] sm:$0xff]  ;;  %v786_v41 = vld [vmem:[#allocation8 + $0x120] sm:$0xff]  ;;  %1409 = vmatprep.subr.mxu1 %v919_v36 }
  0x65   :  { %1339 = vmatpush1.msra.mxu0 %v790_v37  ;;  %v914_v42 = vld [vmem:[#allocation8 + $0x520] sm:$0xff]  ;;  %v783_v43 = vld [vmem:[#allocation8 + $0x108] sm:$0xff]  ;;  %1410 = vmatpush1.msra.mxu1 %v918_v38 }
  0x66   :  { %1340 = vmatprep.subr.mxu0 %v787_v39  ;;  %v911_v44 = vld [vmem:[#allocation8 + $0x508] sm:$0xff]  ;;  %v782_v45 = vld [vmem:[#allocation8 + $0x100] sm:$0xff]  ;;  %1411 = vmatprep.subr.mxu1 %v915_v40 }
  0x67   :  { %1341 = vmatpush1.msra.mxu0 %v786_v41  ;;  %v910_v46 = vld [vmem:[#allocation8 + $0x500] sm:$0xff]  ;;  %v779_v47 = vld [vmem:[#allocation8 + $0xe8] sm:$0xff]  ;;  %1412 = vmatpush1.msra.mxu1 %v914_v42 }
  0x68   :  { %1342 = vmatprep.subr.mxu0 %v783_v43  ;;  %v907_v48 = vld [vmem:[#allocation8 + $0x4e8] sm:$0xff]  ;;  %v778_v49 = vld [vmem:[#allocation8 + $0xe0] sm:$0xff]  ;;  %1413 = vmatprep.subr.mxu1 %v911_v44 }
  0x69   :  { %1343 = vmatpush1.msra.mxu0 %v782_v45  ;;  %v906_v50 = vld [vmem:[#allocation8 + $0x4e0] sm:$0xff]  ;;  %v775_v51 = vld [vmem:[#allocation8 + $0xc8] sm:$0xff]  ;;  %1414 = vmatpush1.msra.mxu1 %v910_v46 }
  0x6a   :  { %1344 = vmatprep.subr.mxu0 %v779_v47  ;;  %v903_v52 = vld [vmem:[#allocation8 + $0x4c8] sm:$0xff]  ;;  %v774_v53 = vld [vmem:[#allocation8 + $0xc0] sm:$0xff]  ;;  %1415 = vmatprep.subr.mxu1 %v907_v48 }
  0x6b   :  { %1345 = vmatpush1.msra.mxu0 %v778_v49  ;;  %v902_v54 = vld [vmem:[#allocation8 + $0x4c0] sm:$0xff]  ;;  %v771_v55 = vld [vmem:[#allocation8 + $0xa8] sm:$0xff]  ;;  %1416 = vmatpush1.msra.mxu1 %v906_v50 }
  0x6c   :  { %1346 = vmatprep.subr.mxu0 %v775_v51  ;;  %v899_v56 = vld [vmem:[#allocation8 + $0x4a8] sm:$0xff]  ;;  %v770_v57 = vld [vmem:[#allocation8 + $0xa0] sm:$0xff]  ;;  %1417 = vmatprep.subr.mxu1 %v903_v52 }
  0x6d   :  { %1347 = vmatpush1.msra.mxu0 %v774_v53  ;;  %v898_v58 = vld [vmem:[#allocation8 + $0x4a0] sm:$0xff]  ;;  %v767_v59 = vld [vmem:[#allocation8 + $0x88] sm:$0xff]  ;;  %1418 = vmatpush1.msra.mxu1 %v902_v54 }
  0x6e   :  { %1348 = vmatprep.subr.mxu0 %v771_v55  ;;  %v895_v60 = vld [vmem:[#allocation8 + $0x488] sm:$0xff]  ;;  %v766_v61 = vld [vmem:[#allocation8 + $0x80] sm:$0xff]  ;;  %1419 = vmatprep.subr.mxu1 %v899_v56 }
  0x6f   :  { %1349 = vmatpush1.msra.mxu0 %v770_v57  ;;  %v894_v62 = vld [vmem:[#allocation8 + $0x480] sm:$0xff]  ;;  %v763_v63 = vld [vmem:[#allocation8 + $0x68] sm:$0xff]  ;;  %1420 = vmatpush1.msra.mxu1 %v898_v58 }
  0x70   :  { %1350 = vmatprep.subr.mxu0 %v767_v59  ;;  %v891_v0 = vld [vmem:[#allocation8 + $0x468] sm:$0xff]  ;;  %v762_v1 = vld [vmem:[#allocation8 + $0x60] sm:$0xff]  ;;  %1421 = vmatprep.subr.mxu1 %v895_v60 }
  0x71   :  { %1351 = vmatpush1.msra.mxu0 %v766_v61  ;;  %v890_v2 = vld [vmem:[#allocation8 + $0x460] sm:$0xff]  ;;  %v759_v3 = vld [vmem:[#allocation8 + $0x48] sm:$0xff]  ;;  %1422 = vmatpush1.msra.mxu1 %v894_v62 }
  0x72   :  { %1352 = vmatprep.subr.mxu0 %v763_v63  ;;  %v887_v4 = vld [vmem:[#allocation8 + $0x448] sm:$0xff]  ;;  %v758_v5 = vld [vmem:[#allocation8 + $0x40] sm:$0xff]  ;;  %1423 = vmatprep.subr.mxu1 %v891_v0 }
  0x73   :  { %1353 = vmatpush1.msra.mxu0 %v762_v1  ;;  %v886_v6 = vld [vmem:[#allocation8 + $0x440] sm:$0xff]  ;;  %v755_v7 = vld [vmem:[#allocation8 + $0x28] sm:$0xff]  ;;  %1424 = vmatpush1.msra.mxu1 %v890_v2 }
  0x74   :  { %1354 = vmatprep.subr.mxu0 %v759_v3  ;;  %v883_v8 = vld [vmem:[#allocation8 + $0x428] sm:$0xff]  ;;  %v754_v9 = vld [vmem:[#allocation8 + $0x20] sm:$0xff]  ;;  %1425 = vmatprep.subr.mxu1 %v887_v4 }
  0x75   :  { %1355 = vmatpush1.msra.mxu0 %v758_v5  ;;  %v882_v10 = vld [vmem:[#allocation8 + $0x420] sm:$0xff]  ;;  %v751_v11 = vld [vmem:[#allocation8 + $0x8] sm:$0xff]  ;;  %1426 = vmatpush1.msra.mxu1 %v886_v6 }
  0x76   :  { %1356 = vmatprep.subr.mxu0 %v755_v7  ;;  %v879_v12 = vld [vmem:[#allocation8 + $0x408] sm:$0xff]  ;;  %v750_v13 = vld [vmem:[#allocation8] sm:$0xff]  ;;  %1427 = vmatprep.subr.mxu1 %v883_v8 }
  0x77   :  { %1357 = vmatpush1.msra.mxu0 %v754_v9  ;;  %v878_v14 = vld [vmem:[#allocation8 + $0x400] sm:$0xff]  ;;  %v875_v15 = vld [vmem:[#allocation8 + $0x3e8] sm:$0xff]  ;;  %1428 = vmatpush1.msra.mxu1 %v882_v10 }
  0x78   :  { %1358 = vmatprep.subr.mxu0 %v751_v11  ;;  %v1003_v16 = vld [vmem:[#allocation8 + $0x7e8] sm:$0xff]  ;;  %v874_v17 = vld [vmem:[#allocation8 + $0x3e0] sm:$0xff]  ;;  %1429 = vmatprep.subr.mxu1 %v879_v12 }
  0x79   :  { %1359 = vmatpush1.msra.mxu0 %v750_v13  ;;  %v1002_v18 = vld [vmem:[#allocation8 + $0x7e0] sm:$0xff]  ;;  %v871_v19 = vld [vmem:[#allocation8 + $0x3c8] sm:$0xff]  ;;  %1430 = vmatpush1.msra.mxu1 %v878_v14 }
  0x7a   :  { %1360 = vmatprep.subr.mxu0 %v875_v15  ;;  %v999_v20 = vld [vmem:[#allocation8 + $0x7c8] sm:$0xff]  ;;  %v870_v21 = vld [vmem:[#allocation8 + $0x3c0] sm:$0xff]  ;;  %1431 = vmatprep.subr.mxu1 %v1003_v16 }
  0x7b   :  { %1361 = vmatpush2.msra.mxu0 %v874_v17  ;;  %v998_v22 = vld [vmem:[#allocation8 + $0x7c0] sm:$0xff]  ;;  %v867_v23 = vld [vmem:[#allocation8 + $0x3a8] sm:$0xff]  ;;  %1432 = vmatpush2.msra.mxu1 %v1002_v18  ;;  %v150_v17 = vlaneseq }
  0x7c   :  { %1362 = vmatprep.subr.mxu0 %v871_v19  ;;  %v995_v24 = vld [vmem:[#allocation8 + $0x7a8] sm:$0xff]  ;;  %v866_v25 = vld [vmem:[#allocation8 + $0x3a0] sm:$0xff]  ;;  %1433 = vmatprep.subr.mxu1 %v999_v20 }
  0x7d   :  { %1363 = vmatpush2.msra.mxu0 %v870_v21  ;;  %v994_v26 = vld [vmem:[#allocation8 + $0x7a0] sm:$0xff]  ;;  %v863_v27 = vld [vmem:[#allocation8 + $0x388] sm:$0xff]  ;;  %1434 = vmatpush2.msra.mxu1 %v998_v22  ;;  %v2524_v18 = vshrl.u32 %v150_v17, 7 }
  0x7e   :  { %1364 = vmatprep.subr.mxu0 %v867_v23  ;;  %v991_v28 = vld [vmem:[#allocation8 + $0x788] sm:$0xff]  ;;  %v862_v29 = vld [vmem:[#allocation8 + $0x380] sm:$0xff]  ;;  %1435 = vmatprep.subr.mxu1 %v995_v24 }
  0x7f   :  { %1365 = vmatpush2.msra.mxu0 %v866_v25  ;;  %v990_v30 = vld [vmem:[#allocation8 + $0x780] sm:$0xff]  ;;  %v859_v31 = vld [vmem:[#allocation8 + $0x368] sm:$0xff]  ;;  %1436 = vmatpush2.msra.mxu1 %v994_v26  ;;  %2917 = vst [vmem:[#allocation19_spill] sm:$0xff] %v2524_v18  ;;  %v2527_v19 = vsub.s32 0, %v2524_v18  ;;  %v2530_v21 = vsub.s32 4, %v2524_v18  ;;  %v2533_v23 = vsub.s32 1, %v2524_v18 }
  0x80   :  { %1366 = vmatprep.subr.mxu0 %v863_v27  ;;  %v987_v32 = vld [vmem:[#allocation8 + $0x768] sm:$0xff]  ;;  %v858_v33 = vld [vmem:[#allocation8 + $0x360] sm:$0xff]  ;;  %1437 = vmatprep.subr.mxu1 %v991_v28  ;;  %v2536_v24 = vsub.s32 5, %v2524_v18  ;;  %v2539_v25 = vsub.s32 2, %v2524_v18  ;;  %v2543_v27 = vsub.s32 6, %v2524_v18 }
  0x81   :  { %1367 = vmatpush2.msra.mxu0 %v862_v29  ;;  %v986_v34 = vld [vmem:[#allocation8 + $0x760] sm:$0xff]  ;;  %v855_v35 = vld [vmem:[#allocation8 + $0x348] sm:$0xff]  ;;  %1438 = vmatpush2.msra.mxu1 %v990_v30  ;;  %2918 = vst [vmem:[#allocation20_spill] sm:$0xff] %v2527_v19  ;;  %2919 = vst [vmem:[#allocation21_spill] sm:$0xff] %v2533_v23 }
  0x82   :  { %1368 = vmatprep.subr.mxu0 %v859_v31  ;;  %v983_v36 = vld [vmem:[#allocation8 + $0x748] sm:$0xff]  ;;  %v854_v37 = vld [vmem:[#allocation8 + $0x340] sm:$0xff]  ;;  %1439 = vmatprep.subr.mxu1 %v987_v32  ;;  %2920 = vst [vmem:[#allocation22_spill] sm:$0xff] %v2539_v25 }
  0x83   :  { %1369 = vmatpush2.msra.mxu0 %v858_v33  ;;  %v982_v38 = vld [vmem:[#allocation8 + $0x740] sm:$0xff]  ;;  %v851_v39 = vld [vmem:[#allocation8 + $0x328] sm:$0xff]  ;;  %1440 = vmatpush2.msra.mxu1 %v986_v34 }
  0x84   :  { %1370 = vmatprep.subr.mxu0 %v855_v35  ;;  %v979_v40 = vld [vmem:[#allocation8 + $0x728] sm:$0xff]  ;;  %v850_v41 = vld [vmem:[#allocation8 + $0x320] sm:$0xff]  ;;  %1441 = vmatprep.subr.mxu1 %v983_v36 }
  0x85   :  { %1371 = vmatpush2.msra.mxu0 %v854_v37  ;;  %v978_v42 = vld [vmem:[#allocation8 + $0x720] sm:$0xff]  ;;  %v847_v43 = vld [vmem:[#allocation8 + $0x308] sm:$0xff]  ;;  %1442 = vmatpush2.msra.mxu1 %v982_v38 }
  0x86   :  { %1372 = vmatprep.subr.mxu0 %v851_v39  ;;  %v975_v44 = vld [vmem:[#allocation8 + $0x708] sm:$0xff]  ;;  %v846_v45 = vld [vmem:[#allocation8 + $0x300] sm:$0xff]  ;;  %1443 = vmatprep.subr.mxu1 %v979_v40 }
  0x87   :  { %1373 = vmatpush2.msra.mxu0 %v850_v41  ;;  %v974_v46 = vld [vmem:[#allocation8 + $0x700] sm:$0xff]  ;;  %v843_v47 = vld [vmem:[#allocation8 + $0x2e8] sm:$0xff]  ;;  %1444 = vmatpush2.msra.mxu1 %v978_v42 }
  0x88   :  { %1374 = vmatprep.subr.mxu0 %v847_v43  ;;  %v971_v48 = vld [vmem:[#allocation8 + $0x6e8] sm:$0xff]  ;;  %v842_v49 = vld [vmem:[#allocation8 + $0x2e0] sm:$0xff]  ;;  %1445 = vmatprep.subr.mxu1 %v975_v44 }
  0x89   :  { %1375 = vmatpush2.msra.mxu0 %v846_v45  ;;  %v970_v50 = vld [vmem:[#allocation8 + $0x6e0] sm:$0xff]  ;;  %v839_v51 = vld [vmem:[#allocation8 + $0x2c8] sm:$0xff]  ;;  %1446 = vmatpush2.msra.mxu1 %v974_v46 }
  0x8a   :  { %1376 = vmatprep.subr.mxu0 %v843_v47  ;;  %v967_v52 = vld [vmem:[#allocation8 + $0x6c8] sm:$0xff]  ;;  %v838_v53 = vld [vmem:[#allocation8 + $0x2c0] sm:$0xff]  ;;  %1447 = vmatprep.subr.mxu1 %v971_v48 }
  0x8b   :  { %1377 = vmatpush2.msra.mxu0 %v842_v49  ;;  %v966_v54 = vld [vmem:[#allocation8 + $0x6c0] sm:$0xff]  ;;  %v835_v55 = vld [vmem:[#allocation8 + $0x2a8] sm:$0xff]  ;;  %1448 = vmatpush2.msra.mxu1 %v970_v50 }
  0x8c   :  { %1378 = vmatprep.subr.mxu0 %v839_v51  ;;  %v963_v56 = vld [vmem:[#allocation8 + $0x6a8] sm:$0xff]  ;;  %v834_v57 = vld [vmem:[#allocation8 + $0x2a0] sm:$0xff]  ;;  %1449 = vmatprep.subr.mxu1 %v967_v52 }
  0x8d   :  { %1379 = vmatpush2.msra.mxu0 %v838_v53  ;;  %v962_v58 = vld [vmem:[#allocation8 + $0x6a0] sm:$0xff]  ;;  %v831_v59 = vld [vmem:[#allocation8 + $0x288] sm:$0xff]  ;;  %1450 = vmatpush2.msra.mxu1 %v966_v54 }
  0x8e   :  { %1380 = vmatprep.subr.mxu0 %v835_v55  ;;  %v959_v60 = vld [vmem:[#allocation8 + $0x688] sm:$0xff]  ;;  %v830_v61 = vld [vmem:[#allocation8 + $0x280] sm:$0xff]  ;;  %1451 = vmatprep.subr.mxu1 %v963_v56 }
  0x8f   :  { %1381 = vmatpush2.msra.mxu0 %v834_v57  ;;  %v958_v62 = vld [vmem:[#allocation8 + $0x680] sm:$0xff]  ;;  %v827_v63 = vld [vmem:[#allocation8 + $0x268] sm:$0xff]  ;;  %1452 = vmatpush2.msra.mxu1 %v962_v58  ;;  %v120_v58 = vld [vmem:[#allocation4 + $0x10] sm:$0x77] }
  0x90   :  { %1382 = vmatprep.subr.mxu0 %v831_v59  ;;  %v955_v0 = vld [vmem:[#allocation8 + $0x668] sm:$0xff]  ;;  %v826_v1 = vld [vmem:[#allocation8 + $0x260] sm:$0xff]  ;;  %1453 = vmatprep.subr.mxu1 %v959_v60 }
  0x91   :  { %1383 = vmatpush2.msra.mxu0 %v830_v61  ;;  %v954_v2 = vld [vmem:[#allocation8 + $0x660] sm:$0xff]  ;;  %v823_v3 = vld [vmem:[#allocation8 + $0x248] sm:$0xff]  ;;  %1454 = vmatpush2.msra.mxu1 %v958_v62 }
  0x92   :  { %1384 = vmatprep.subr.mxu0 %v827_v63  ;;  %v951_v4 = vld [vmem:[#allocation8 + $0x648] sm:$0xff]  ;;  %v822_v5 = vld [vmem:[#allocation8 + $0x240] sm:$0xff]  ;;  %1455 = vmatprep.subr.mxu1 %v955_v0  ;;  %v124_v63 = vld [vmem:[#allocation6 + $0x10] sm:$0x77] }
  0x93   :  { %1385 = vmatpush2.msra.mxu0 %v826_v1  ;;  %v950_v6 = vld [vmem:[#allocation8 + $0x640] sm:$0xff]  ;;  %v819_v7 = vld [vmem:[#allocation8 + $0x228] sm:$0xff]  ;;  %1456 = vmatpush2.msra.mxu1 %v954_v2 }
  0x94   :  { %1386 = vmatprep.subr.mxu0 %v823_v3  ;;  %v947_v8 = vld [vmem:[#allocation8 + $0x628] sm:$0xff]  ;;  %v818_v9 = vld [vmem:[#allocation8 + $0x220] sm:$0xff]  ;;  %1457 = vmatprep.subr.mxu1 %v951_v4 }
  0x95   :  { %1387 = vmatpush2.msra.mxu0 %v822_v5  ;;  %v946_v10 = vld [vmem:[#allocation8 + $0x620] sm:$0xff]  ;;  %v815_v11 = vld [vmem:[#allocation8 + $0x208] sm:$0xff]  ;;  %1458 = vmatpush2.msra.mxu1 %v950_v6 }
  0x96   :  { %1388 = vmatprep.subr.mxu0 %v819_v7  ;;  %v943_v12 = vld [vmem:[#allocation8 + $0x608] sm:$0xff]  ;;  %v814_v13 = vld [vmem:[#allocation8 + $0x200] sm:$0xff]  ;;  %1459 = vmatprep.subr.mxu1 %v947_v8  ;;  %v169_v7 = vrot.slane %v120_v58, %v2527_v19 }
  0x97   :  { %1389 = vmatpush2.msra.mxu0 %v818_v9  ;;  %v942_v14 = vld [vmem:[#allocation8 + $0x600] sm:$0xff]  ;;  %v1067_v15 = vld [vmem:[#allocation8 + $0x9e8] sm:$0xff]  ;;  %1460 = vmatpush2.msra.mxu1 %v946_v10  ;;  %v173_v9 = vrot.slane %v120_v58, %v2530_v21  ;;  %v253_v10 = vrot.slane %v124_v63, %v2527_v19 }
  0x98   :  { %1390 = vmatprep.subr.mxu0 %v815_v11  ;;  %v1195_v16 = vld [vmem:[#allocation8 + $0xde8] sm:$0xff]  ;;  %1461 = vmatprep.subr.mxu1 %v943_v12  ;;  %v118_v20 = vld [vmem:[#allocation4] sm:$0x77]  ;;  %v257_v11 = vrot.slane %v124_v63, %v2530_v21 }
  0x99   :  { %1391 = vmatpush2.msra.mxu0 %v814_v13  ;;  %1462 = vmatpush2.msra.mxu1 %v942_v14  ;;  %v122_v22 = vld [vmem:[#allocation6] sm:$0x77]  ;;  %v153_v26 = vrot.slane %v118_v20, %v2527_v19  ;;  %v157_v28 = vrot.slane %v118_v20, %v2530_v21  ;;  %v335_v31 = vrot.slane %v118_v20, %v2533_v23  ;;  %v119_v32 = vld [vmem:[#allocation4 + $0x8] sm:$0x77] }
  0x9a   :  { %1470 = vmatprep.subr.mxu0 %v1067_v15  ;;  %1541 = vmatprep.subr.mxu1 %v1195_v16  ;;  %v237_v29 = vrot.slane %v122_v22, %v2527_v19  ;;  %v241_v30 = vrot.slane %v122_v22, %v2530_v21  ;;  %v339_v33 = vrot.slane %v118_v20, %v2536_v24  ;;  %v123_v37 = vld [vmem:[#allocation6 + $0x8] sm:$0x77] }
  0x9b   :  { %v415_v34 = vrot.slane %v122_v22, %v2533_v23  ;;  %v419_v35 = vrot.slane %v122_v22, %v2536_v24  ;;  %v529_v36 = vrot.slane %v118_v20, %v2539_v25  ;;  %v2554_v38 = vrot.slane %v153_v26, %v2527_v19 }
  0x9c   :  { %v533_v39 = vrot.slane %v118_v20, %v2543_v27  ;;  %v609_v40 = vrot.slane %v122_v22, %v2539_v25  ;;  %v613_v41 = vrot.slane %v122_v22, %v2543_v27  ;;  %v2560_v42 = vrot.slane %v157_v28, %v2527_v19 }
  0x9d   :  { %v2563_v43 = vrot.slane %v237_v29, %v2527_v19  ;;  %v161_v44 = vrot.slane %v119_v32, %v2527_v19  ;;  %v165_v45 = vrot.slane %v119_v32, %v2530_v21  ;;  %v2568_v46 = vrot.slane %v241_v30, %v2527_v19 }
  0x9e   :  { %v2571_v47 = vrot.slane %v335_v31, %v2533_v23  ;;  %v245_v48 = vrot.slane %v123_v37, %v2527_v19  ;;  %v249_v49 = vrot.slane %v123_v37, %v2530_v21  ;;  %v2576_v50 = vrot.slane %v339_v33, %v2533_v23  ;;  %v121_v31 = vld [vmem:[#allocation4 + $0x18] sm:$0x77] }
  0x9f   :  { %v2579_v51 = vrot.slane %v415_v34, %v2533_v23  ;;  %v2582_v52 = vrot.slane %v419_v35, %v2533_v23  ;;  %v2585_v53 = vrot.slane %v529_v36, %v2539_v25  ;;  %v2588_v54 = vrot.slane %v533_v39, %v2539_v25  ;;  %v125_v36 = vld [vmem:[#allocation6 + $0x18] sm:$0x77] }
  0xa0   :  { %v2591_v55 = vrot.slane %v609_v40, %v2539_v25  ;;  %v2594_v56 = vrot.slane %v613_v41, %v2539_v25  ;;  %v343_v57 = vrot.slane %v119_v32, %v2533_v23  ;;  %v2598_v59 = vrot.slane %v161_v44, %v2527_v19 }
  0xa1   :  { %v2601_v60 = vrot.slane %v165_v45, %v2527_v19  ;;  %v347_v61 = vrot.slane %v119_v32, %v2536_v24  ;;  %v423_v62 = vrot.slane %v123_v37, %v2533_v23  ;;  %v2606_v0 = vrot.slane %v245_v48, %v2527_v19 }
  0xa2   :  { %v2609_v1 = vrot.slane %v249_v49, %v2527_v19  ;;  %v427_v2 = vrot.slane %v123_v37, %v2536_v24  ;;  %v537_v3 = vrot.slane %v119_v32, %v2539_v25  ;;  %v541_v4 = vrot.slane %v119_v32, %v2543_v27 }
  0xa3   :  { %v617_v5 = vrot.slane %v123_v37, %v2539_v25  ;;  %v621_v6 = vrot.slane %v123_v37, %v2543_v27  ;;  %v2618_v8 = vrot.slane %v343_v57, %v2533_v23  ;;  %v2624_v12 = vrot.slane %v347_v61, %v2533_v23 }
  0xa4   :  { %v2627_v13 = vrot.slane %v423_v62, %v2533_v23  ;;  %v351_v14 = vrot.slane %v120_v58, %v2533_v23  ;;  %v355_v15 = vrot.slane %v120_v58, %v2536_v24  ;;  %v2632_v16 = vrot.slane %v427_v2, %v2533_v23 }
  0xa5   :  { %v2635_v17 = vrot.slane %v537_v3, %v2539_v25  ;;  %v431_v20 = vrot.slane %v124_v63, %v2533_v23  ;;  %v435_v22 = vrot.slane %v124_v63, %v2536_v24  ;;  %v2640_v26 = vrot.slane %v541_v4, %v2539_v25 }
  0xa6   :  { %v2643_v28 = vrot.slane %v617_v5, %v2539_v25  ;;  %v2646_v29 = vrot.slane %v621_v6, %v2539_v25  ;;  %v2649_v30 = vrot.slane %v169_v7, %v2527_v19  ;;  %v2652_v32 = vrot.slane %v173_v9, %v2527_v19 }
  0xa7   :  { %v2655_v33 = vrot.slane %v253_v10, %v2527_v19  ;;  %v2658_v34 = vrot.slane %v257_v11, %v2527_v19  ;;  %v545_v35 = vrot.slane %v120_v58, %v2539_v25  ;;  %v2662_v37 = vrot.slane %v351_v14, %v2533_v23 }
  0xa8   :  { %v2665_v39 = vrot.slane %v355_v15, %v2533_v23  ;;  %v549_v40 = vrot.slane %v120_v58, %v2543_v27  ;;  %v625_v41 = vrot.slane %v124_v63, %v2539_v25  ;;  %v2670_v44 = vrot.slane %v431_v20, %v2533_v23 }
  0xa9   :  { %v2673_v45 = vrot.slane %v435_v22, %v2533_v23  ;;  %v629_v48 = vrot.slane %v124_v63, %v2543_v27  ;;  %v177_v49 = vrot.slane %v121_v31, %v2527_v19  ;;  %v181_v57 = vrot.slane %v121_v31, %v2530_v21 }
  0xaa   :  { %v261_v61 = vrot.slane %v125_v36, %v2527_v19  ;;  %v265_v62 = vrot.slane %v125_v36, %v2530_v21  ;;  %v359_v58 = vrot.slane %v121_v31, %v2533_v23  ;;  %v2682_v2 = vrot.slane %v545_v35, %v2539_v25 }
  0xab   :  { %v363_v3 = vrot.slane %v121_v31, %v2536_v24  ;;  %v439_v4 = vrot.slane %v125_v36, %v2533_v23  ;;  %v443_v5 = vrot.slane %v125_v36, %v2536_v24  ;;  %v553_v63 = vrot.slane %v121_v31, %v2539_v25 }
  0xac   :  { %v557_v6 = vrot.slane %v121_v31, %v2543_v27  ;;  %v633_v7 = vrot.slane %v125_v36, %v2539_v25  ;;  %v637_v9 = vrot.slane %v125_v36, %v2543_v27  ;;  %v2692_v21 = vrot.slane %v549_v40, %v2539_v25 }
  0xad   :  { %v2695_v10 = vrot.slane %v625_v41, %v2539_v25  ;;  %v2698_v11 = vrot.slane %v629_v48, %v2539_v25  ;;  %v2701_v14 = vrot.slane %v177_v49, %v2527_v19  ;;  %v2704_v15 = vrot.slane %v181_v57, %v2527_v19 }
  0xae   :  { %v2707_v20 = vrot.slane %v261_v61, %v2527_v19  ;;  %v2710_v27 = vrot.slane %v265_v62, %v2527_v19  ;;  %v2713_v22 = vrot.slane %v359_v58, %v2533_v23  ;;  %v2718_v35 = vrot.slane %v363_v3, %v2533_v23 }
  0xaf   :  { %v2721_v36 = vrot.slane %v439_v4, %v2533_v23  ;;  %v2724_v40 = vrot.slane %v443_v5, %v2533_v23  ;;  %v2727_v48 = vrot.slane %v553_v63, %v2539_v25  ;;  %v2730_v49 = vrot.slane %v557_v6, %v2539_v25 }
  0xb0   :  { %v2733_v57 = vrot.slane %v633_v7, %v2539_v25  ;;  %v2736_v61 = vrot.slane %v637_v9, %v2539_v25 }
  0xb1   :  { %2921 = vst [vmem:[#allocation23_spill] sm:$0xff] %v2730_v49 }
  0xb2   :  { %2922 = vst [vmem:[#allocation24_spill] sm:$0xff] %v2733_v57  ;;  %2923 = vst [vmem:[#allocation25_spill] sm:$0xff] %v2736_v61 }
  0xe6   :  { %v143_v24 = vpop.xlane.xlu0 %142 }
  0xe7   :  { %v2715_v31 = vmul.f32 0.00390625, %v143_v24 }
  0xe8   :  { %v524_v41 = vpop.xlane.xlu1 %523 }
  0xe9   :  { %v2738_v62 = vmul.f32 0.00390625, %v524_v41  ;;  %v222_v58 = vmul.f32 %v2554_v38, %v2715_v31  ;;  %v223_v3 = vmul.f32 %v2560_v42, %v2715_v31  ;;  %v306_v4 = vmul.f32 %v2563_v43, %v2715_v31 }
  0xea   :  { %v330_v5 = vpop.xlane.xlu0 %329  ;;  %v307_v63 = vmul.f32 %v2568_v46, %v2715_v31  ;;  %v224_v6 = vmul.f32 %v2598_v59, %v2715_v31  ;;  %v225_v7 = vmul.f32 %v2601_v60, %v2715_v31  ;;  %v308_v9 = vmul.f32 %v2606_v0, %v2715_v31 }
  0xeb   :  { %v2754_v38 = vmul.f32 0.00390625, %v330_v5  ;;  %v598_v42 = vmul.f32 %v2585_v53, %v2738_v62  ;;  %v599_v43 = vmul.f32 %v2588_v54, %v2738_v62  ;;  %v678_v46 = vmul.f32 %v2591_v55, %v2738_v62 }
  0xec   :  { %v679_v59 = vmul.f32 %v2594_v56, %v2738_v62  ;;  %v309_v60 = vmul.f32 %v2609_v1, %v2715_v31  ;;  %v600_v0 = vmul.f32 %v2635_v17, %v2738_v62  ;;  %v601_v24 = vmul.f32 %v2640_v26, %v2738_v62 }
  0xed   :  { %v404_v53 = vmul.f32 %v2571_v47, %v2754_v38  ;;  %v405_v54 = vmul.f32 %v2576_v50, %v2754_v38  ;;  %v484_v55 = vmul.f32 %v2579_v51, %v2754_v38  ;;  %v485_v56 = vmul.f32 %v2582_v52, %v2754_v38 }
  0xee   :  { %v406_v1 = vmul.f32 %v2618_v8, %v2754_v38  ;;  %v407_v17 = vmul.f32 %v2624_v12, %v2754_v38  ;;  %v486_v26 = vmul.f32 %v2627_v13, %v2754_v38  ;;  %v487_v47 = vmul.f32 %v2632_v16, %v2754_v38 }
  0xef   :  { %v492_v41 = vadd.f32 %v404_v53, %v222_v58  ;;  %v493_v50 = vadd.f32 %v405_v54, %v223_v3  ;;  %v500_v5 = vadd.f32 %v484_v55, %v306_v4  ;;  %v501_v25 = vadd.f32 %v485_v56, %v307_v63  ;;  %v2924_v54 = vld [vmem:[#allocation23_spill] sm:$0xff]  ;;  %v2925_v56 = vld [vmem:[#allocation24_spill] sm:$0xff] }
  0xf0   :  { %v494_v51 = vadd.f32 %v406_v1, %v224_v6  ;;  %v495_v23 = vadd.f32 %v407_v17, %v225_v7  ;;  %v502_v18 = vadd.f32 %v486_v26, %v308_v9  ;;  %v503_v52 = vadd.f32 %v487_v47, %v309_v60  ;;  %v2926_v26 = vld [vmem:[#allocation25_spill] sm:$0xff] }
  0xf1   :  { %v686_v19 = vadd.f32 %v598_v42, %v492_v41  ;;  %v687_v61 = vadd.f32 %v599_v43, %v493_v50  ;;  %v694_v8 = vadd.f32 %v678_v46, %v500_v5  ;;  %v695_v57 = vadd.f32 %v679_v59, %v501_v25  ;;  %v1066_v50 = vld [vmem:[#allocation8 + $0x9e0] sm:$0xff] }
  0xf2   :  { %v680_v12 = vmul.f32 %v2643_v28, %v2738_v62  ;;  %v681_v13 = vmul.f32 %v2646_v29, %v2738_v62  ;;  %v688_v49 = vadd.f32 %v600_v0, %v494_v51  ;;  %v689_v16 = vadd.f32 %v601_v24, %v495_v23 }
  0xf3   :  { %v710_v58 = vcombine.low %v686_v19, %v687_v61  ;;  %v730_v3 = vcombine.low %v694_v8, %v695_v57  ;;  %v226_v4 = vmul.f32 %v2649_v30, %v2715_v31  ;;  %v227_v63 = vmul.f32 %v2652_v32, %v2715_v31 }
  0xf4   :  { %v696_v6 = vadd.f32 %v680_v12, %v502_v18  ;;  %v697_v7 = vadd.f32 %v681_v13, %v503_v52  ;;  %v711_v9 = vcombine.low %v688_v49, %v689_v16  ;;  %v310_v25 = vmul.f32 %v2655_v33, %v2715_v31  ;;  %v1063_v52 = vld [vmem:[#allocation8 + $0x9c8] sm:$0xff]  ;;  %v1062_v16 = vld [vmem:[#allocation8 + $0x9c0] sm:$0xff] }
  0xf5   :  { %718 = vst [vmem:[#allocation2 + $0x10] sm:$0x33] %v710_v58  ;;  %v734_v28 = vrot.slane %v730_v3, 6  ;;  %v311_v29 = vmul.f32 %v2658_v34, %v2715_v31  ;;  %v408_v19 = vmul.f32 %v2662_v37, %v2754_v38  ;;  %v409_v23 = vmul.f32 %v2665_v39, %v2754_v38  ;;  %v1059_v58 = vld [vmem:[#allocation8 + $0x9a8] sm:$0xff] }
  0xf6   :  { %719 = vst [vmem:[#allocation2] sm:$0x33] %v711_v9  ;;  %v731_v30 = vcombine.low %v696_v6, %v697_v7  ;;  %v488_v18 = vmul.f32 %v2670_v44, %v2754_v38  ;;  %v489_v32 = vmul.f32 %v2673_v45, %v2754_v38  ;;  %v602_v33 = vmul.f32 %v2682_v2, %v2738_v62  ;;  %v1191_v3 = vld [vmem:[#allocation8 + $0xdc8] sm:$0xff]  ;;  %v1190_v6 = vld [vmem:[#allocation8 + $0xdc0] sm:$0xff] }
  0xf7   :  { %742 = vst [vmem:[#allocation2 + $0x10] sm:$0xcc] %v734_v28  ;;  %v496_v49 = vadd.f32 %v408_v19, %v226_v4  ;;  %v497_v34 = vadd.f32 %v409_v23, %v227_v63  ;;  %v603_v37 = vmul.f32 %v2692_v21, %v2738_v62  ;;  %v682_v39 = vmul.f32 %v2695_v10, %v2738_v62  ;;  %v1058_v63 = vld [vmem:[#allocation8 + $0x9a0] sm:$0xff]  ;;  %v1055_v7 = vld [vmem:[#allocation8 + $0x988] sm:$0xff] }
  0xf8   :  { %v735_v57 = vrot.slane %v731_v30, 6  ;;  %v504_v61 = vadd.f32 %v488_v18, %v310_v25  ;;  %v505_v42 = vadd.f32 %v489_v32, %v311_v29  ;;  %v683_v44 = vmul.f32 %v2698_v11, %v2738_v62  ;;  %v1187_v9 = vld [vmem:[#allocation8 + $0xda8] sm:$0xff]  ;;  %v1054_v25 = vld [vmem:[#allocation8 + $0x980] sm:$0xff] }
  0xf9   :  { %v690_v43 = vadd.f32 %v602_v33, %v496_v49  ;;  %v691_v45 = vadd.f32 %v603_v37, %v497_v34  ;;  %v228_v2 = vmul.f32 %v2701_v14, %v2715_v31  ;;  %v229_v46 = vmul.f32 %v2704_v15, %v2715_v31  ;;  %v1186_v29 = vld [vmem:[#allocation8 + $0xda0] sm:$0xff]  ;;  %v1183_v23 = vld [vmem:[#allocation8 + $0xd88] sm:$0xff] }
  0xfa   :  { %743 = vst [vmem:[#allocation2] sm:$0xcc] %v735_v57  ;;  %v698_v59 = vadd.f32 %v682_v39, %v504_v61  ;;  %v699_v21 = vadd.f32 %v683_v44, %v505_v42  ;;  %v312_v10 = vmul.f32 %v2707_v20, %v2715_v31  ;;  %v313_v60 = vmul.f32 %v2710_v27, %v2715_v31  ;;  %v1051_v30 = vld [vmem:[#allocation8 + $0x968] sm:$0xff]  ;;  %v1182_v18 = vld [vmem:[#allocation8 + $0xd80] sm:$0xff] }
  0xfb   :  { %v712_v0 = vcombine.low %v690_v43, %v691_v45  ;;  %v410_v11 = vmul.f32 %v2713_v22, %v2754_v38  ;;  %v411_v24 = vmul.f32 %v2718_v35, %v2754_v38  ;;  %v490_v14 = vmul.f32 %v2721_v36, %v2754_v38  ;;  %v1050_v32 = vld [vmem:[#allocation8 + $0x960] sm:$0xff]  ;;  %v1179_v33 = vld [vmem:[#allocation8 + $0xd68] sm:$0xff] }
  0xfc   :  { %v732_v15 = vcombine.low %v698_v59, %v699_v21  ;;  %v491_v53 = vmul.f32 %v2724_v40, %v2754_v38  ;;  %v604_v20 = vmul.f32 %v2727_v48, %v2738_v62  ;;  %v605_v27 = vmul.f32 %v2924_v54, %v2738_v62  ;;  %v1047_v49 = vld [vmem:[#allocation8 + $0x948] sm:$0xff]  ;;  %v1178_v34 = vld [vmem:[#allocation8 + $0xd60] sm:$0xff] }
  0xfd   :  { %720 = vst [vmem:[#allocation2 + $0x18] sm:$0x33] %v712_v0  ;;  %v498_v31 = vadd.f32 %v410_v11, %v228_v2  ;;  %v499_v55 = vadd.f32 %v411_v24, %v229_v46  ;;  %v506_v22 = vadd.f32 %v490_v14, %v312_v10  ;;  %v684_v35 = vmul.f32 %v2925_v56, %v2738_v62  ;;  %v1046_v37 = vld [vmem:[#allocation8 + $0x940] sm:$0xff]  ;;  %v1175_v39 = vld [vmem:[#allocation8 + $0xd48] sm:$0xff] }
  0xfe   :  { %v746_v1 = vld [vmem:[#allocation2 + $0x10] sm:$0xff]  ;;  %v736_v17 = vrot.slane %v732_v15, 6  ;;  %v507_v36 = vadd.f32 %v491_v53, %v313_v60  ;;  %v685_v47 = vmul.f32 %v2926_v26, %v2738_v62  ;;  %v1194_v62 = vld [vmem:[#allocation8 + $0xde0] sm:$0xff]  ;;  %v1043_v57 = vld [vmem:[#allocation8 + $0x928] sm:$0xff] }
  0xff   :  { %v2838_v40 = vcombine.high %v746_v1, %v746_v1  ;;  %v692_v38 = vadd.f32 %v604_v20, %v498_v31  ;;  %v693_v48 = vadd.f32 %v605_v27, %v499_v55  ;;  %v700_v41 = vadd.f32 %v684_v35, %v506_v22  ;;  %v1174_v42 = vld [vmem:[#allocation8 + $0xd40] sm:$0xff]  ;;  %v1171_v43 = vld [vmem:[#allocation8 + $0xd28] sm:$0xff] }
 0x100   :  { %744 = vst [vmem:[#allocation2 + $0x18] sm:$0xcc] %v736_v17  ;;  %v701_v5 = vadd.f32 %v685_v47, %v507_v36  ;;  %v1042_v45 = vld [vmem:[#allocation8 + $0x920] sm:$0xff]  ;;  %v1039_v46 = vld [vmem:[#allocation8 + $0x908] sm:$0xff] }
 0x101   :  { %1392 = vmatprep.mubr.f32.mxu0 %v2838_v40  ;;  %v747_v51 = vld [vmem:[#allocation2] sm:$0xff]  ;;  %v713_v8 = vcombine.low %v692_v38, %v693_v48  ;;  %v1167_v59 = vld [vmem:[#allocation8 + $0xd08] sm:$0xff] }
 0x102   :  { %v2841_v12 = vcombine.high %v747_v51, %v747_v51  ;;  %1393 = vmatmul.mubr.f32.vlgmr.msra.gmra.mxu0 %v746_v1  ;;  %v733_v13 = vcombine.low %v700_v41, %v701_v5  ;;  %v1170_v2 = vld [vmem:[#allocation8 + $0xd20] sm:$0xff]  ;;  %v1035_v60 = vld [vmem:[#allocation8 + $0x8e8] sm:$0xff] }
 0x103   :  { %1471 = vmatpush1.msra.mxu0 %v1066_v50  ;;  %721 = vst [vmem:[#allocation2 + $0x8] sm:$0x33] %v713_v8  ;;  %v1038_v21 = vld [vmem:[#allocation8 + $0x900] sm:$0xff]  ;;  %v1163_v0 = vld [vmem:[#allocation8 + $0xce8] sm:$0xff] }
 0x104   :  { %1463 = vmatprep.mubr.f32.mxu1 %v2841_v12  ;;  %1472 = vmatprep.subr.mxu0 %v1063_v52  ;;  %v737_v4 = vrot.slane %v733_v13, 6  ;;  %v1166_v10 = vld [vmem:[#allocation8 + $0xd00] sm:$0xff]  ;;  %v1031_v14 = vld [vmem:[#allocation8 + $0x8c8] sm:$0xff] }
 0x105   :  { %1464 = vmatmul.mubr.f32.vlgmr.msra.gmra.mxu1 %v747_v51  ;;  %1473 = vmatpush1.msra.mxu0 %v1062_v16  ;;  %v1034_v11 = vld [vmem:[#allocation8 + $0x8e0] sm:$0xff]  ;;  %v1159_v15 = vld [vmem:[#allocation8 + $0xcc8] sm:$0xff] }
 0x106   :  { %1542 = vmatpush1.msra.mxu1 %v1194_v62  ;;  %745 = vst [vmem:[#allocation2 + $0x8] sm:$0xcc] %v737_v4  ;;  %1474 = vmatprep.subr.mxu0 %v1059_v58  ;;  %v1162_v24 = vld [vmem:[#allocation8 + $0xce0] sm:$0xff]  ;;  %v1027_v54 = vld [vmem:[#allocation8 + $0x8a8] sm:$0xff] }
 0x107   :  { %v2844_v28 = vld [vmem:[#allocation2 + $0x18] sm:$0xff]  ;;  %1543 = vmatprep.subr.mxu1 %v1191_v3  ;;  %1475 = vmatpush1.msra.mxu0 %v1058_v63  ;;  %v1030_v53 = vld [vmem:[#allocation8 + $0x8c0] sm:$0xff]  ;;  %v1155_v27 = vld [vmem:[#allocation8 + $0xca8] sm:$0xff] }
 0x108   :  { %v2848_v19 = vcombine.high %v2844_v28, %v2844_v28  ;;  %1544 = vmatpush1.msra.mxu1 %v1190_v6  ;;  %1476 = vmatprep.subr.mxu0 %v1055_v7  ;;  %v1158_v20 = vld [vmem:[#allocation8 + $0xcc0] sm:$0xff]  ;;  %v1023_v22 = vld [vmem:[#allocation8 + $0x888] sm:$0xff] }
 0x109   :  { %1545 = vmatprep.subr.mxu1 %v1187_v9  ;;  %1477 = vmatpush1.msra.mxu0 %v1054_v25  ;;  %v1026_v31 = vld [vmem:[#allocation8 + $0x8a0] sm:$0xff]  ;;  %v1151_v56 = vld [vmem:[#allocation8 + $0xc88] sm:$0xff] }
 0x10a   :  { %1534 = vmatprep.mubr.f32.mxu0 %v2848_v19  ;;  %1546 = vmatpush1.msra.mxu1 %v1186_v29  ;;  %v1154_v55 = vld [vmem:[#allocation8 + $0xca0] sm:$0xff]  ;;  %v1019_v17 = vld [vmem:[#allocation8 + $0x868] sm:$0xff] }
 0x10b   :  { %1547 = vmatprep.subr.mxu1 %v1183_v23  ;;  %1478 = vmatprep.subr.mxu0 %v1051_v30  ;;  %v1022_v35 = vld [vmem:[#allocation8 + $0x880] sm:$0xff]  ;;  %v1147_v36 = vld [vmem:[#allocation8 + $0xc68] sm:$0xff] }
 0x10c   :  { %1548 = vmatpush1.msra.mxu1 %v1182_v18  ;;  %1479 = vmatpush1.msra.mxu0 %v1050_v32  ;;  %v1150_v1 = vld [vmem:[#allocation8 + $0xc80] sm:$0xff]  ;;  %v1015_v38 = vld [vmem:[#allocation8 + $0x848] sm:$0xff] }
 0x10d   :  { %v2851_v61 = vld [vmem:[#allocation2 + $0x8] sm:$0xff]  ;;  %1549 = vmatprep.subr.mxu1 %v1179_v33  ;;  %1480 = vmatprep.subr.mxu0 %v1047_v49  ;;  %v1018_v26 = vld [vmem:[#allocation8 + $0x860] sm:$0xff] }
 0x10e   :  { %v2855_v44 = vcombine.high %v2851_v61, %v2851_v61  ;;  %1550 = vmatpush1.msra.mxu1 %v1178_v34  ;;  %1481 = vmatpush1.msra.mxu0 %v1046_v37  ;;  %v1146_v47 = vld [vmem:[#allocation8 + $0xc60] sm:$0xff]  ;;  %v1143_v48 = vld [vmem:[#allocation8 + $0xc48] sm:$0xff] }
 0x10f   :  { %1551 = vmatprep.subr.mxu1 %v1175_v39  ;;  %1482 = vmatprep.subr.mxu0 %v1043_v57  ;;  %v1014_v41 = vld [vmem:[#allocation8 + $0x840] sm:$0xff]  ;;  %v1011_v5 = vld [vmem:[#allocation8 + $0x828] sm:$0xff] }
 0x110   :  { %1605 = vmatprep.mubr.f32.mxu1 %v2855_v44  ;;  %1552 = vmatpush1.msra.mxu1 %v1174_v42  ;;  %v1142_v50 = vld [vmem:[#allocation8 + $0xc40] sm:$0xff]  ;;  %v1139_v51 = vld [vmem:[#allocation8 + $0xc28] sm:$0xff] }
 0x111   :  { %1553 = vmatprep.subr.mxu1 %v1171_v43  ;;  %1483 = vmatpush1.msra.mxu0 %v1042_v45  ;;  %v1010_v52 = vld [vmem:[#allocation8 + $0x820] sm:$0xff]  ;;  %v1007_v13 = vld [vmem:[#allocation8 + $0x808] sm:$0xff] }
 0x112   :  { %1554 = vmatpush1.msra.mxu1 %v1170_v2  ;;  %1484 = vmatprep.subr.mxu0 %v1039_v46  ;;  %v1138_v8 = vld [vmem:[#allocation8 + $0xc20] sm:$0xff]  ;;  %v1135_v16 = vld [vmem:[#allocation8 + $0xc08] sm:$0xff] }
 0x113   :  { %1555 = vmatprep.subr.mxu1 %v1167_v59  ;;  %1485 = vmatpush1.msra.mxu0 %v1038_v21  ;;  %v1006_v62 = vld [vmem:[#allocation8 + $0x800] sm:$0xff]  ;;  %v1131_v3 = vld [vmem:[#allocation8 + $0xbe8] sm:$0xff] }
 0x114   :  { %1556 = vmatpush1.msra.mxu1 %v1166_v10  ;;  %1486 = vmatprep.subr.mxu0 %v1035_v60  ;;  %v1134_v58 = vld [vmem:[#allocation8 + $0xc00] sm:$0xff]  ;;  %v1259_v4 = vld [vmem:[#allocation8 + $0xfe8] sm:$0xff] }
 0x115   :  { %1557 = vmatprep.subr.mxu1 %v1163_v0  ;;  %1487 = vmatpush1.msra.mxu0 %v1034_v11  ;;  %v1130_v63 = vld [vmem:[#allocation8 + $0xbe0] sm:$0xff]  ;;  %v1127_v7 = vld [vmem:[#allocation8 + $0xbc8] sm:$0xff] }
 0x116   :  { %1558 = vmatpush1.msra.mxu1 %v1162_v24  ;;  %1488 = vmatprep.subr.mxu0 %v1031_v14  ;;  %v1258_v6 = vld [vmem:[#allocation8 + $0xfe0] sm:$0xff]  ;;  %v1255_v9 = vld [vmem:[#allocation8 + $0xfc8] sm:$0xff] }
 0x117   :  { %1559 = vmatprep.subr.mxu1 %v1159_v15  ;;  %1489 = vmatpush1.msra.mxu0 %v1030_v53  ;;  %v1126_v25 = vld [vmem:[#allocation8 + $0xbc0] sm:$0xff]  ;;  %v1123_v23 = vld [vmem:[#allocation8 + $0xba8] sm:$0xff] }
 0x118   :  { %1560 = vmatpush1.msra.mxu1 %v1158_v20  ;;  %1490 = vmatprep.subr.mxu0 %v1027_v54  ;;  %v1254_v29 = vld [vmem:[#allocation8 + $0xfc0] sm:$0xff]  ;;  %v1251_v30 = vld [vmem:[#allocation8 + $0xfa8] sm:$0xff] }
 0x119   :  { %1561 = vmatprep.subr.mxu1 %v1155_v27  ;;  %1491 = vmatpush1.msra.mxu0 %v1026_v31  ;;  %v1122_v18 = vld [vmem:[#allocation8 + $0xba0] sm:$0xff]  ;;  %v1119_v33 = vld [vmem:[#allocation8 + $0xb88] sm:$0xff] }
 0x11a   :  { %1562 = vmatpush1.msra.mxu1 %v1154_v55  ;;  %1492 = vmatprep.subr.mxu0 %v1023_v22  ;;  %v1250_v32 = vld [vmem:[#allocation8 + $0xfa0] sm:$0xff]  ;;  %v1247_v49 = vld [vmem:[#allocation8 + $0xf88] sm:$0xff] }
 0x11b   :  { %1563 = vmatprep.subr.mxu1 %v1151_v56  ;;  %1493 = vmatpush1.msra.mxu0 %v1022_v35  ;;  %v1118_v34 = vld [vmem:[#allocation8 + $0xb80] sm:$0xff]  ;;  %v1115_v39 = vld [vmem:[#allocation8 + $0xb68] sm:$0xff] }
 0x11c   :  { %1564 = vmatpush1.msra.mxu1 %v1150_v1  ;;  %1494 = vmatprep.subr.mxu0 %v1019_v17  ;;  %v1246_v37 = vld [vmem:[#allocation8 + $0xf80] sm:$0xff]  ;;  %v1243_v57 = vld [vmem:[#allocation8 + $0xf68] sm:$0xff] }
 0x11d   :  { %1565 = vmatprep.subr.mxu1 %v1147_v36  ;;  %1495 = vmatpush1.msra.mxu0 %v1018_v26  ;;  %v1114_v42 = vld [vmem:[#allocation8 + $0xb60] sm:$0xff]  ;;  %v1111_v45 = vld [vmem:[#allocation8 + $0xb48] sm:$0xff] }
 0x11e   :  { %1566 = vmatpush1.msra.mxu1 %v1146_v47  ;;  %1496 = vmatprep.subr.mxu0 %v1015_v38  ;;  %v1242_v43 = vld [vmem:[#allocation8 + $0xf60] sm:$0xff]  ;;  %v1239_v2 = vld [vmem:[#allocation8 + $0xf48] sm:$0xff] }
 0x11f   :  { %1567 = vmatprep.subr.mxu1 %v1143_v48  ;;  %1497 = vmatpush1.msra.mxu0 %v1014_v41  ;;  %v1110_v46 = vld [vmem:[#allocation8 + $0xb40] sm:$0xff]  ;;  %v1107_v21 = vld [vmem:[#allocation8 + $0xb28] sm:$0xff] }
 0x120   :  { %1568 = vmatpush1.msra.mxu1 %v1142_v50  ;;  %1498 = vmatprep.subr.mxu0 %v1011_v5  ;;  %v1238_v59 = vld [vmem:[#allocation8 + $0xf40] sm:$0xff]  ;;  %v1235_v10 = vld [vmem:[#allocation8 + $0xf28] sm:$0xff] }
 0x121   :  { %1569 = vmatprep.subr.mxu1 %v1139_v51  ;;  %1499 = vmatpush1.msra.mxu0 %v1010_v52  ;;  %v1106_v60 = vld [vmem:[#allocation8 + $0xb20] sm:$0xff]  ;;  %v1103_v11 = vld [vmem:[#allocation8 + $0xb08] sm:$0xff] }
 0x122   :  { %1570 = vmatpush1.msra.mxu1 %v1138_v8  ;;  %1500 = vmatprep.subr.mxu0 %v1007_v13  ;;  %v1234_v0 = vld [vmem:[#allocation8 + $0xf20] sm:$0xff]  ;;  %v1231_v24 = vld [vmem:[#allocation8 + $0xf08] sm:$0xff] }
 0x123   :  { %1571 = vmatprep.subr.mxu1 %v1135_v16  ;;  %1501 = vmatpush1.msra.mxu0 %v1006_v62  ;;  %v1102_v14 = vld [vmem:[#allocation8 + $0xb00] sm:$0xff]  ;;  %v1099_v53 = vld [vmem:[#allocation8 + $0xae8] sm:$0xff] }
 0x124   :  { %1572 = vmatpush1.msra.mxu1 %v1134_v58  ;;  %1502 = vmatprep.subr.mxu0 %v1131_v3  ;;  %v1230_v15 = vld [vmem:[#allocation8 + $0xf00] sm:$0xff]  ;;  %v1227_v20 = vld [vmem:[#allocation8 + $0xee8] sm:$0xff] }
 0x125   :  { %1573 = vmatprep.subr.mxu1 %v1259_v4  ;;  %1503 = vmatpush2.msra.mxu0 %v1130_v63  ;;  %v1098_v54 = vld [vmem:[#allocation8 + $0xae0] sm:$0xff]  ;;  %v1095_v31 = vld [vmem:[#allocation8 + $0xac8] sm:$0xff] }
 0x126   :  { %1574 = vmatpush2.msra.mxu1 %v1258_v6  ;;  %1504 = vmatprep.subr.mxu0 %v1127_v7  ;;  %v1226_v27 = vld [vmem:[#allocation8 + $0xee0] sm:$0xff]  ;;  %v1223_v55 = vld [vmem:[#allocation8 + $0xec8] sm:$0xff] }
 0x127   :  { %1575 = vmatprep.subr.mxu1 %v1255_v9  ;;  %1505 = vmatpush2.msra.mxu0 %v1126_v25  ;;  %v1094_v22 = vld [vmem:[#allocation8 + $0xac0] sm:$0xff]  ;;  %v1091_v35 = vld [vmem:[#allocation8 + $0xaa8] sm:$0xff]  ;;  %v813_v25 = vld [vmem:[#allocation8 + $0x1f8] sm:$0xff] }
 0x128   :  { %1576 = vmatpush2.msra.mxu1 %v1254_v29  ;;  %1506 = vmatprep.subr.mxu0 %v1123_v23  ;;  %v1222_v56 = vld [vmem:[#allocation8 + $0xec0] sm:$0xff]  ;;  %v1219_v1 = vld [vmem:[#allocation8 + $0xea8] sm:$0xff]  ;;  %v941_v29 = vld [vmem:[#allocation8 + $0x5f8] sm:$0xff] }
 0x129   :  { %1577 = vmatprep.subr.mxu1 %v1251_v30  ;;  %1507 = vmatpush2.msra.mxu0 %v1122_v18  ;;  %v1090_v17 = vld [vmem:[#allocation8 + $0xaa0] sm:$0xff]  ;;  %v1087_v26 = vld [vmem:[#allocation8 + $0xa88] sm:$0xff]  ;;  %v812_v23 = vld [vmem:[#allocation8 + $0x1f0] sm:$0xff] }
 0x12a   :  { %1578 = vmatpush2.msra.mxu1 %v1250_v32  ;;  %1508 = vmatprep.subr.mxu0 %v1119_v33  ;;  %v1218_v36 = vld [vmem:[#allocation8 + $0xea0] sm:$0xff]  ;;  %v1215_v47 = vld [vmem:[#allocation8 + $0xe88] sm:$0xff]  ;;  %v940_v30 = vld [vmem:[#allocation8 + $0x5f0] sm:$0xff] }
 0x12b   :  { %1579 = vmatprep.subr.mxu1 %v1247_v49  ;;  %1509 = vmatpush2.msra.mxu0 %v1118_v34  ;;  %v1086_v38 = vld [vmem:[#allocation8 + $0xa80] sm:$0xff]  ;;  %v1083_v41 = vld [vmem:[#allocation8 + $0xa68] sm:$0xff]  ;;  %v809_v18 = vld [vmem:[#allocation8 + $0x1d8] sm:$0xff] }
 0x12c   :  { %1580 = vmatpush2.msra.mxu1 %v1246_v37  ;;  %1510 = vmatprep.subr.mxu0 %v1115_v39  ;;  %v1214_v48 = vld [vmem:[#allocation8 + $0xe80] sm:$0xff]  ;;  %v1211_v50 = vld [vmem:[#allocation8 + $0xe68] sm:$0xff]  ;;  %v937_v32 = vld [vmem:[#allocation8 + $0x5d8] sm:$0xff] }
 0x12d   :  { %1581 = vmatprep.subr.mxu1 %v1243_v57  ;;  %1511 = vmatpush2.msra.mxu0 %v1114_v42  ;;  %v1082_v5 = vld [vmem:[#allocation8 + $0xa60] sm:$0xff]  ;;  %v1079_v52 = vld [vmem:[#allocation8 + $0xa48] sm:$0xff]  ;;  %v808_v33 = vld [vmem:[#allocation8 + $0x1d0] sm:$0xff] }
 0x12e   :  { %1582 = vmatpush2.msra.mxu1 %v1242_v43  ;;  %1512 = vmatprep.subr.mxu0 %v1111_v45  ;;  %v1210_v51 = vld [vmem:[#allocation8 + $0xe60] sm:$0xff]  ;;  %v1207_v8 = vld [vmem:[#allocation8 + $0xe48] sm:$0xff]  ;;  %v936_v49 = vld [vmem:[#allocation8 + $0x5d0] sm:$0xff] }
 0x12f   :  { %1583 = vmatprep.subr.mxu1 %v1239_v2  ;;  %1513 = vmatpush2.msra.mxu0 %v1110_v46  ;;  %v1078_v13 = vld [vmem:[#allocation8 + $0xa40] sm:$0xff]  ;;  %v1075_v62 = vld [vmem:[#allocation8 + $0xa28] sm:$0xff]  ;;  %v805_v34 = vld [vmem:[#allocation8 + $0x1b8] sm:$0xff] }
 0x130   :  { %1584 = vmatpush2.msra.mxu1 %v1238_v59  ;;  %1514 = vmatprep.subr.mxu0 %v1107_v21  ;;  %v1206_v16 = vld [vmem:[#allocation8 + $0xe40] sm:$0xff]  ;;  %v1203_v58 = vld [vmem:[#allocation8 + $0xe28] sm:$0xff]  ;;  %v933_v37 = vld [vmem:[#allocation8 + $0x5b8] sm:$0xff] }
 0x131   :  { %1585 = vmatprep.subr.mxu1 %v1235_v10  ;;  %1515 = vmatpush2.msra.mxu0 %v1106_v60  ;;  %v1074_v3 = vld [vmem:[#allocation8 + $0xa20] sm:$0xff]  ;;  %v1071_v63 = vld [vmem:[#allocation8 + $0xa08] sm:$0xff]  ;;  %v804_v39 = vld [vmem:[#allocation8 + $0x1b0] sm:$0xff] }
 0x132   :  { %1586 = vmatpush2.msra.mxu1 %v1234_v0  ;;  %1516 = vmatprep.subr.mxu0 %v1103_v11  ;;  %v1202_v4 = vld [vmem:[#allocation8 + $0xe20] sm:$0xff]  ;;  %v1199_v6 = vld [vmem:[#allocation8 + $0xe08] sm:$0xff]  ;;  %v929_v57 = vld [vmem:[#allocation8 + $0x598] sm:$0xff] }
 0x133   :  { %1587 = vmatprep.subr.mxu1 %v1231_v24  ;;  %1517 = vmatpush2.msra.mxu0 %v1102_v14  ;;  %v1070_v7 = vld [vmem:[#allocation8 + $0xa00] sm:$0xff]  ;;  %v800_v42 = vld [vmem:[#allocation8 + $0x190] sm:$0xff]  ;;  %v925_v45 = vld [vmem:[#allocation8 + $0x578] sm:$0xff] }
 0x134   :  { %1588 = vmatpush2.msra.mxu1 %v1230_v15  ;;  %1518 = vmatprep.subr.mxu0 %v1099_v53  ;;  %v1198_v9 = vld [vmem:[#allocation8 + $0xe00] sm:$0xff]  ;;  %v928_v43 = vld [vmem:[#allocation8 + $0x590] sm:$0xff]  ;;  %v793_v46 = vld [vmem:[#allocation8 + $0x158] sm:$0xff] }
 0x135   :  { %1589 = vmatprep.subr.mxu1 %v1227_v20  ;;  %1519 = vmatpush2.msra.mxu0 %v1098_v54  ;;  %v796_v2 = vld [vmem:[#allocation8 + $0x170] sm:$0xff]  ;;  %v921_v59 = vld [vmem:[#allocation8 + $0x558] sm:$0xff] }
 0x136   :  { %1590 = vmatpush2.msra.mxu1 %v1226_v27  ;;  %1520 = vmatprep.subr.mxu0 %v1095_v31  ;;  %v792_v21 = vld [vmem:[#allocation8 + $0x150] sm:$0xff]  ;;  %v789_v60 = vld [vmem:[#allocation8 + $0x138] sm:$0xff] }
 0x137   :  { %1591 = vmatprep.subr.mxu1 %v1223_v55  ;;  %1521 = vmatpush2.msra.mxu0 %v1094_v22  ;;  %v920_v10 = vld [vmem:[#allocation8 + $0x550] sm:$0xff]  ;;  %v917_v0 = vld [vmem:[#allocation8 + $0x538] sm:$0xff] }
 0x138   :  { %1592 = vmatpush2.msra.mxu1 %v1222_v56  ;;  %1522 = vmatprep.subr.mxu0 %v1091_v35  ;;  %v788_v11 = vld [vmem:[#allocation8 + $0x130] sm:$0xff]  ;;  %v785_v14 = vld [vmem:[#allocation8 + $0x118] sm:$0xff] }
 0x139   :  { %1593 = vmatprep.subr.mxu1 %v1219_v1  ;;  %1523 = vmatpush2.msra.mxu0 %v1090_v17  ;;  %v916_v24 = vld [vmem:[#allocation8 + $0x530] sm:$0xff]  ;;  %v913_v15 = vld [vmem:[#allocation8 + $0x518] sm:$0xff] }
 0x13a   :  { %1594 = vmatpush2.msra.mxu1 %v1218_v36  ;;  %1524 = vmatprep.subr.mxu0 %v1087_v26  ;;  %v784_v53 = vld [vmem:[#allocation8 + $0x110] sm:$0xff]  ;;  %v781_v54 = vld [vmem:[#allocation8 + $0xf8] sm:$0xff] }
 0x13b   :  { %1595 = vmatprep.subr.mxu1 %v1215_v47  ;;  %1525 = vmatpush2.msra.mxu0 %v1086_v38  ;;  %v912_v20 = vld [vmem:[#allocation8 + $0x510] sm:$0xff]  ;;  %v909_v27 = vld [vmem:[#allocation8 + $0x4f8] sm:$0xff] }
 0x13c   :  { %1596 = vmatpush2.msra.mxu1 %v1214_v48  ;;  %1526 = vmatprep.subr.mxu0 %v1083_v41  ;;  %v780_v31 = vld [vmem:[#allocation8 + $0xf0] sm:$0xff]  ;;  %v777_v22 = vld [vmem:[#allocation8 + $0xd8] sm:$0xff] }
 0x13d   :  { %1597 = vmatprep.subr.mxu1 %v1211_v50  ;;  %1527 = vmatpush2.msra.mxu0 %v1082_v5  ;;  %v908_v55 = vld [vmem:[#allocation8 + $0x4f0] sm:$0xff]  ;;  %v905_v56 = vld [vmem:[#allocation8 + $0x4d8] sm:$0xff] }
 0x13e   :  { %1598 = vmatpush2.msra.mxu1 %v1210_v51  ;;  %1528 = vmatprep.subr.mxu0 %v1079_v52  ;;  %v776_v35 = vld [vmem:[#allocation8 + $0xd0] sm:$0xff]  ;;  %v773_v17 = vld [vmem:[#allocation8 + $0xb8] sm:$0xff] }
 0x13f   :  { %1599 = vmatprep.subr.mxu1 %v1207_v8  ;;  %1529 = vmatpush2.msra.mxu0 %v1078_v13  ;;  %v904_v1 = vld [vmem:[#allocation8 + $0x4d0] sm:$0xff]  ;;  %v901_v36 = vld [vmem:[#allocation8 + $0x4b8] sm:$0xff] }
 0x140   :  { %1600 = vmatpush2.msra.mxu1 %v1206_v16  ;;  %1530 = vmatprep.subr.mxu0 %v1075_v62  ;;  %v772_v26 = vld [vmem:[#allocation8 + $0xb0] sm:$0xff]  ;;  %v769_v38 = vld [vmem:[#allocation8 + $0x98] sm:$0xff] }
 0x141   :  { %1601 = vmatprep.subr.mxu1 %v1203_v58  ;;  %1531 = vmatpush2.msra.mxu0 %v1074_v3  ;;  %v900_v47 = vld [vmem:[#allocation8 + $0x4b0] sm:$0xff]  ;;  %v897_v48 = vld [vmem:[#allocation8 + $0x498] sm:$0xff] }
 0x142   :  { %1602 = vmatpush2.msra.mxu1 %v1202_v4  ;;  %1532 = vmatprep.subr.mxu0 %v1071_v63  ;;  %v768_v41 = vld [vmem:[#allocation8 + $0x90] sm:$0xff]  ;;  %v765_v5 = vld [vmem:[#allocation8 + $0x78] sm:$0xff] }
 0x143   :  { %1603 = vmatprep.subr.mxu1 %v1199_v6  ;;  %1533 = vmatpush2.msra.mxu0 %v1070_v7  ;;  %v896_v50 = vld [vmem:[#allocation8 + $0x490] sm:$0xff]  ;;  %v893_v51 = vld [vmem:[#allocation8 + $0x478] sm:$0xff] }
 0x144   :  { %1604 = vmatpush2.msra.mxu1 %v1198_v9  ;;  %1535 = vmatmul.mubr.f32.vlgmr.msra.gmra.mxu0 %v2844_v28  ;;  %v932_v28 = vld [vmem:[#allocation8 + $0x5b0] sm:$0xff]  ;;  %v761_v13 = vld [vmem:[#allocation8 + $0x58] sm:$0xff] }
 0x145   :  { %1606 = vmatmul.mubr.f32.vlgmr.msra.gmra.mxu1 %v2851_v61  ;;  %1612 = vmatprep.subr.mxu0 %v813_v25  ;;  %v801_v61 = vld [vmem:[#allocation8 + $0x198] sm:$0xff]  ;;  %v764_v52 = vld [vmem:[#allocation8 + $0x70] sm:$0xff] }
 0x146   :  { %1683 = vmatprep.subr.mxu1 %v941_v29  ;;  %1613 = vmatpush1.msra.mxu0 %v812_v23  ;;  %v892_v8 = vld [vmem:[#allocation8 + $0x470] sm:$0xff]  ;;  %v889_v16 = vld [vmem:[#allocation8 + $0x458] sm:$0xff] }
 0x147   :  { %1676 = vmatprep.mubr.f32.mxu0 %v2838_v40  ;;  %1684 = vmatpush1.msra.mxu1 %v940_v30  ;;  %v797_v40 = vld [vmem:[#allocation8 + $0x178] sm:$0xff]  ;;  %v760_v62 = vld [vmem:[#allocation8 + $0x50] sm:$0xff] }
 0x148   :  { %1747 = vmatprep.mubr.f32.mxu1 %v2841_v12  ;;  %1614 = vmatprep.subr.mxu0 %v809_v18  ;;  %v924_v12 = vld [vmem:[#allocation8 + $0x570] sm:$0xff]  ;;  %v757_v3 = vld [vmem:[#allocation8 + $0x38] sm:$0xff] }
 0x149   :  { %1685 = vmatprep.subr.mxu1 %v937_v32  ;;  %1615 = vmatpush1.msra.mxu0 %v808_v33  ;;  %v888_v58 = vld [vmem:[#allocation8 + $0x450] sm:$0xff]  ;;  %v885_v4 = vld [vmem:[#allocation8 + $0x438] sm:$0xff] }
 0x14a   :  { %1686 = vmatpush1.msra.mxu1 %v936_v49  ;;  %1616 = vmatprep.subr.mxu0 %v805_v34  ;;  %v756_v63 = vld [vmem:[#allocation8 + $0x30] sm:$0xff]  ;;  %v753_v7 = vld [vmem:[#allocation8 + $0x18] sm:$0xff] }
 0x14b   :  { %1687 = vmatprep.subr.mxu1 %v933_v37  ;;  %1617 = vmatpush1.msra.mxu0 %v804_v39  ;;  %v884_v6 = vld [vmem:[#allocation8 + $0x430] sm:$0xff]  ;;  %v881_v9 = vld [vmem:[#allocation8 + $0x418] sm:$0xff] }
 0x14c   :  { %1688 = vmatpush1.msra.mxu1 %v932_v28  ;;  %1618 = vmatprep.subr.mxu0 %v801_v61  ;;  %v752_v25 = vld [vmem:[#allocation8 + $0x10] sm:$0xff]  ;;  %v877_v23 = vld [vmem:[#allocation8 + $0x3f8] sm:$0xff] }
 0x14d   :  { %1689 = vmatprep.subr.mxu1 %v929_v57  ;;  %1619 = vmatpush1.msra.mxu0 %v800_v42  ;;  %v880_v29 = vld [vmem:[#allocation8 + $0x410] sm:$0xff]  ;;  %v1005_v30 = vld [vmem:[#allocation8 + $0x7f8] sm:$0xff] }
 0x14e   :  { %1690 = vmatpush1.msra.mxu1 %v928_v43  ;;  %1620 = vmatprep.subr.mxu0 %v797_v40  ;;  %v876_v18 = vld [vmem:[#allocation8 + $0x3f0] sm:$0xff]  ;;  %v873_v33 = vld [vmem:[#allocation8 + $0x3d8] sm:$0xff] }
 0x14f   :  { %1691 = vmatprep.subr.mxu1 %v925_v45  ;;  %1621 = vmatpush1.msra.mxu0 %v796_v2  ;;  %v1004_v32 = vld [vmem:[#allocation8 + $0x7f0] sm:$0xff]  ;;  %v1001_v49 = vld [vmem:[#allocation8 + $0x7d8] sm:$0xff] }
 0x150   :  { %1692 = vmatpush1.msra.mxu1 %v924_v12  ;;  %1622 = vmatprep.subr.mxu0 %v793_v46  ;;  %v872_v34 = vld [vmem:[#allocation8 + $0x3d0] sm:$0xff]  ;;  %v869_v39 = vld [vmem:[#allocation8 + $0x3b8] sm:$0xff] }
 0x151   :  { %1693 = vmatprep.subr.mxu1 %v921_v59  ;;  %1623 = vmatpush1.msra.mxu0 %v792_v21  ;;  %v1000_v37 = vld [vmem:[#allocation8 + $0x7d0] sm:$0xff]  ;;  %v997_v28 = vld [vmem:[#allocation8 + $0x7b8] sm:$0xff] }
 0x152   :  { %1694 = vmatpush1.msra.mxu1 %v920_v10  ;;  %1624 = vmatprep.subr.mxu0 %v789_v60  ;;  %v868_v61 = vld [vmem:[#allocation8 + $0x3b0] sm:$0xff]  ;;  %v865_v42 = vld [vmem:[#allocation8 + $0x398] sm:$0xff] }
 0x153   :  { %1695 = vmatprep.subr.mxu1 %v917_v0  ;;  %1625 = vmatpush1.msra.mxu0 %v788_v11  ;;  %v996_v57 = vld [vmem:[#allocation8 + $0x7b0] sm:$0xff]  ;;  %v993_v43 = vld [vmem:[#allocation8 + $0x798] sm:$0xff] }
 0x154   :  { %1696 = vmatpush1.msra.mxu1 %v916_v24  ;;  %1626 = vmatprep.subr.mxu0 %v785_v14  ;;  %v864_v40 = vld [vmem:[#allocation8 + $0x390] sm:$0xff]  ;;  %v861_v2 = vld [vmem:[#allocation8 + $0x378] sm:$0xff] }
 0x155   :  { %1697 = vmatprep.subr.mxu1 %v913_v15  ;;  %1627 = vmatpush1.msra.mxu0 %v784_v53  ;;  %v992_v45 = vld [vmem:[#allocation8 + $0x790] sm:$0xff]  ;;  %v989_v12 = vld [vmem:[#allocation8 + $0x778] sm:$0xff] }
 0x156   :  { %1698 = vmatpush1.msra.mxu1 %v912_v20  ;;  %1628 = vmatprep.subr.mxu0 %v781_v54  ;;  %v860_v46 = vld [vmem:[#allocation8 + $0x370] sm:$0xff]  ;;  %v857_v21 = vld [vmem:[#allocation8 + $0x358] sm:$0xff] }
 0x157   :  { %1699 = vmatprep.subr.mxu1 %v909_v27  ;;  %1629 = vmatpush1.msra.mxu0 %v780_v31  ;;  %v988_v59 = vld [vmem:[#allocation8 + $0x770] sm:$0xff]  ;;  %v985_v10 = vld [vmem:[#allocation8 + $0x758] sm:$0xff] }
 0x158   :  { %1700 = vmatpush1.msra.mxu1 %v908_v55  ;;  %1630 = vmatprep.subr.mxu0 %v777_v22  ;;  %v856_v60 = vld [vmem:[#allocation8 + $0x350] sm:$0xff]  ;;  %v853_v11 = vld [vmem:[#allocation8 + $0x338] sm:$0xff] }
 0x159   :  { %1701 = vmatprep.subr.mxu1 %v905_v56  ;;  %1631 = vmatpush1.msra.mxu0 %v776_v35  ;;  %v984_v0 = vld [vmem:[#allocation8 + $0x750] sm:$0xff]  ;;  %v981_v24 = vld [vmem:[#allocation8 + $0x738] sm:$0xff] }
 0x15a   :  { %1702 = vmatpush1.msra.mxu1 %v904_v1  ;;  %1632 = vmatprep.subr.mxu0 %v773_v17  ;;  %v852_v14 = vld [vmem:[#allocation8 + $0x330] sm:$0xff]  ;;  %v849_v53 = vld [vmem:[#allocation8 + $0x318] sm:$0xff] }
 0x15b   :  { %1703 = vmatprep.subr.mxu1 %v901_v36  ;;  %1633 = vmatpush1.msra.mxu0 %v772_v26  ;;  %v980_v15 = vld [vmem:[#allocation8 + $0x730] sm:$0xff]  ;;  %v977_v20 = vld [vmem:[#allocation8 + $0x718] sm:$0xff] }
 0x15c   :  { %1704 = vmatpush1.msra.mxu1 %v900_v47  ;;  %1634 = vmatprep.subr.mxu0 %v769_v38  ;;  %v848_v54 = vld [vmem:[#allocation8 + $0x310] sm:$0xff]  ;;  %v845_v31 = vld [vmem:[#allocation8 + $0x2f8] sm:$0xff] }
 0x15d   :  { %1705 = vmatprep.subr.mxu1 %v897_v48  ;;  %1635 = vmatpush1.msra.mxu0 %v768_v41  ;;  %v976_v27 = vld [vmem:[#allocation8 + $0x710] sm:$0xff]  ;;  %v973_v55 = vld [vmem:[#allocation8 + $0x6f8] sm:$0xff] }
 0x15e   :  { %1706 = vmatpush1.msra.mxu1 %v896_v50  ;;  %1636 = vmatprep.subr.mxu0 %v765_v5  ;;  %v844_v22 = vld [vmem:[#allocation8 + $0x2f0] sm:$0xff]  ;;  %v841_v35 = vld [vmem:[#allocation8 + $0x2d8] sm:$0xff] }
 0x15f   :  { %1707 = vmatprep.subr.mxu1 %v893_v51  ;;  %1637 = vmatpush1.msra.mxu0 %v764_v52  ;;  %v972_v56 = vld [vmem:[#allocation8 + $0x6f0] sm:$0xff]  ;;  %v969_v1 = vld [vmem:[#allocation8 + $0x6d8] sm:$0xff] }
 0x160   :  { %1708 = vmatpush1.msra.mxu1 %v892_v8  ;;  %1638 = vmatprep.subr.mxu0 %v761_v13  ;;  %v840_v17 = vld [vmem:[#allocation8 + $0x2d0] sm:$0xff]  ;;  %v837_v26 = vld [vmem:[#allocation8 + $0x2b8] sm:$0xff] }
 0x161   :  { %1709 = vmatprep.subr.mxu1 %v889_v16  ;;  %1639 = vmatpush1.msra.mxu0 %v760_v62  ;;  %v968_v36 = vld [vmem:[#allocation8 + $0x6d0] sm:$0xff]  ;;  %v965_v47 = vld [vmem:[#allocation8 + $0x6b8] sm:$0xff] }
 0x162   :  { %1710 = vmatpush1.msra.mxu1 %v888_v58  ;;  %1640 = vmatprep.subr.mxu0 %v757_v3  ;;  %v836_v38 = vld [vmem:[#allocation8 + $0x2b0] sm:$0xff]  ;;  %v833_v41 = vld [vmem:[#allocation8 + $0x298] sm:$0xff] }
 0x163   :  { %1711 = vmatprep.subr.mxu1 %v885_v4  ;;  %1641 = vmatpush1.msra.mxu0 %v756_v63  ;;  %v964_v48 = vld [vmem:[#allocation8 + $0x6b0] sm:$0xff]  ;;  %v961_v50 = vld [vmem:[#allocation8 + $0x698] sm:$0xff] }
 0x164   :  { %1712 = vmatpush1.msra.mxu1 %v884_v6  ;;  %1642 = vmatprep.subr.mxu0 %v753_v7  ;;  %v832_v5 = vld [vmem:[#allocation8 + $0x290] sm:$0xff]  ;;  %v829_v52 = vld [vmem:[#allocation8 + $0x278] sm:$0xff] }
 0x165   :  { %1713 = vmatprep.subr.mxu1 %v881_v9  ;;  %1643 = vmatpush1.msra.mxu0 %v752_v25  ;;  %v960_v51 = vld [vmem:[#allocation8 + $0x690] sm:$0xff]  ;;  %v957_v8 = vld [vmem:[#allocation8 + $0x678] sm:$0xff] }
 0x166   :  { %1714 = vmatpush1.msra.mxu1 %v880_v29  ;;  %1644 = vmatprep.subr.mxu0 %v877_v23  ;;  %v828_v13 = vld [vmem:[#allocation8 + $0x270] sm:$0xff]  ;;  %v825_v62 = vld [vmem:[#allocation8 + $0x258] sm:$0xff] }
 0x167   :  { %1715 = vmatprep.subr.mxu1 %v1005_v30  ;;  %1645 = vmatpush2.msra.mxu0 %v876_v18  ;;  %v956_v16 = vld [vmem:[#allocation8 + $0x670] sm:$0xff]  ;;  %v953_v58 = vld [vmem:[#allocation8 + $0x658] sm:$0xff] }
 0x168   :  { %1716 = vmatpush2.msra.mxu1 %v1004_v32  ;;  %1646 = vmatprep.subr.mxu0 %v873_v33  ;;  %v824_v3 = vld [vmem:[#allocation8 + $0x250] sm:$0xff]  ;;  %v821_v63 = vld [vmem:[#allocation8 + $0x238] sm:$0xff] }
 0x169   :  { %1717 = vmatprep.subr.mxu1 %v1001_v49  ;;  %1647 = vmatpush2.msra.mxu0 %v872_v34  ;;  %v952_v4 = vld [vmem:[#allocation8 + $0x650] sm:$0xff]  ;;  %v949_v6 = vld [vmem:[#allocation8 + $0x638] sm:$0xff] }
 0x16a   :  { %1718 = vmatpush2.msra.mxu1 %v1000_v37  ;;  %1648 = vmatprep.subr.mxu0 %v869_v39  ;;  %v820_v7 = vld [vmem:[#allocation8 + $0x230] sm:$0xff]  ;;  %v817_v25 = vld [vmem:[#allocation8 + $0x218] sm:$0xff]  ;;  %v2276_v37 = vld [vmem:[#allocation2] sm:$0xff] }
 0x16b   :  { %1719 = vmatprep.subr.mxu1 %v997_v28  ;;  %1649 = vmatpush2.msra.mxu0 %v868_v61  ;;  %v948_v9 = vld [vmem:[#allocation8 + $0x630] sm:$0xff]  ;;  %v945_v29 = vld [vmem:[#allocation8 + $0x618] sm:$0xff] }
 0x16c   :  { %1720 = vmatpush2.msra.mxu1 %v996_v57  ;;  %1650 = vmatprep.subr.mxu0 %v865_v42  ;;  %v816_v23 = vld [vmem:[#allocation8 + $0x210] sm:$0xff]  ;;  %v1069_v18 = vld [vmem:[#allocation8 + $0x9f8] sm:$0xff] }
 0x16d   :  { %1721 = vmatprep.subr.mxu1 %v993_v43  ;;  %1651 = vmatpush2.msra.mxu0 %v864_v40  ;;  %v944_v30 = vld [vmem:[#allocation8 + $0x610] sm:$0xff]  ;;  %v1197_v32 = vld [vmem:[#allocation8 + $0xdf8] sm:$0xff] }
 0x16e   :  { %1722 = vmatpush2.msra.mxu1 %v992_v45  ;;  %1652 = vmatprep.subr.mxu0 %v861_v2  ;;  %v1068_v33 = vld [vmem:[#allocation8 + $0x9f0] sm:$0xff]  ;;  %v1065_v39 = vld [vmem:[#allocation8 + $0x9d8] sm:$0xff] }
 0x16f   :  { %1723 = vmatprep.subr.mxu1 %v989_v12  ;;  %1653 = vmatpush2.msra.mxu0 %v860_v46  ;;  %v2275_v49 = vld [vmem:[#allocation2 + $0x10] sm:$0xff]  ;;  %v1193_v28 = vld [vmem:[#allocation8 + $0xdd8] sm:$0xff] }
 0x170   :  { %1724 = vmatpush2.msra.mxu1 %v988_v59  ;;  %1654 = vmatprep.subr.mxu0 %v857_v21  ;;  %v1196_v34 = vld [vmem:[#allocation8 + $0xdf0] sm:$0xff]  ;;  %v1061_v42 = vld [vmem:[#allocation8 + $0x9b8] sm:$0xff] }
 0x171   :  { %1725 = vmatprep.subr.mxu1 %v985_v10  ;;  %1655 = vmatpush2.msra.mxu0 %v856_v60  ;;  %v1064_v61 = vld [vmem:[#allocation8 + $0x9d0] sm:$0xff]  ;;  %v1189_v43 = vld [vmem:[#allocation8 + $0xdb8] sm:$0xff] }
 0x172   :  { %1726 = vmatpush2.msra.mxu1 %v984_v0  ;;  %1656 = vmatprep.subr.mxu0 %v853_v11  ;;  %v1192_v57 = vld [vmem:[#allocation8 + $0xdd0] sm:$0xff]  ;;  %v1057_v2 = vld [vmem:[#allocation8 + $0x998] sm:$0xff] }
 0x173   :  { %1727 = vmatprep.subr.mxu1 %v981_v24  ;;  %1657 = vmatpush2.msra.mxu0 %v852_v14  ;;  %v1060_v40 = vld [vmem:[#allocation8 + $0x9b0] sm:$0xff]  ;;  %v1185_v12 = vld [vmem:[#allocation8 + $0xd98] sm:$0xff] }
 0x174   :  { %1728 = vmatpush2.msra.mxu1 %v980_v15  ;;  %1658 = vmatprep.subr.mxu0 %v849_v53  ;;  %v1188_v45 = vld [vmem:[#allocation8 + $0xdb0] sm:$0xff]  ;;  %v1181_v21 = vld [vmem:[#allocation8 + $0xd78] sm:$0xff] }
 0x175   :  { %1729 = vmatprep.subr.mxu1 %v977_v20  ;;  %1659 = vmatpush2.msra.mxu0 %v848_v54  ;;  %v1056_v46 = vld [vmem:[#allocation8 + $0x990] sm:$0xff]  ;;  %v1049_v60 = vld [vmem:[#allocation8 + $0x958] sm:$0xff] }
 0x176   :  { %1730 = vmatpush2.msra.mxu1 %v976_v27  ;;  %1660 = vmatprep.subr.mxu0 %v845_v31  ;;  %v1184_v59 = vld [vmem:[#allocation8 + $0xd90] sm:$0xff]  ;;  %v1177_v0 = vld [vmem:[#allocation8 + $0xd58] sm:$0xff] }
 0x177   :  { %1731 = vmatprep.subr.mxu1 %v973_v55  ;;  %1661 = vmatpush2.msra.mxu0 %v844_v22  ;;  %v1052_v10 = vld [vmem:[#allocation8 + $0x970] sm:$0xff]  ;;  %v1045_v14 = vld [vmem:[#allocation8 + $0x938] sm:$0xff] }
 0x178   :  { %1732 = vmatpush2.msra.mxu1 %v972_v56  ;;  %1662 = vmatprep.subr.mxu0 %v841_v35  ;;  %v1048_v11 = vld [vmem:[#allocation8 + $0x950] sm:$0xff]  ;;  %v1173_v15 = vld [vmem:[#allocation8 + $0xd38] sm:$0xff] }
 0x179   :  { %1733 = vmatprep.subr.mxu1 %v969_v1  ;;  %1663 = vmatpush2.msra.mxu0 %v840_v17  ;;  %v1176_v24 = vld [vmem:[#allocation8 + $0xd50] sm:$0xff]  ;;  %v1041_v54 = vld [vmem:[#allocation8 + $0x918] sm:$0xff] }
 0x17a   :  { %1734 = vmatpush2.msra.mxu1 %v968_v36  ;;  %1664 = vmatprep.subr.mxu0 %v837_v26  ;;  %v1044_v53 = vld [vmem:[#allocation8 + $0x930] sm:$0xff]  ;;  %v1169_v27 = vld [vmem:[#allocation8 + $0xd18] sm:$0xff] }
 0x17b   :  { %1735 = vmatprep.subr.mxu1 %v965_v47  ;;  %1665 = vmatpush2.msra.mxu0 %v836_v38  ;;  %v1172_v20 = vld [vmem:[#allocation8 + $0xd30] sm:$0xff]  ;;  %v1037_v22 = vld [vmem:[#allocation8 + $0x8f8] sm:$0xff] }
 0x17c   :  { %1736 = vmatpush2.msra.mxu1 %v964_v48  ;;  %1666 = vmatprep.subr.mxu0 %v833_v41  ;;  %v1040_v31 = vld [vmem:[#allocation8 + $0x910] sm:$0xff]  ;;  %v1165_v56 = vld [vmem:[#allocation8 + $0xcf8] sm:$0xff] }
 0x17d   :  { %1737 = vmatprep.subr.mxu1 %v961_v50  ;;  %1667 = vmatpush2.msra.mxu0 %v832_v5  ;;  %v1168_v55 = vld [vmem:[#allocation8 + $0xd10] sm:$0xff]  ;;  %v1033_v17 = vld [vmem:[#allocation8 + $0x8d8] sm:$0xff] }
 0x17e   :  { %1738 = vmatpush2.msra.mxu1 %v960_v51  ;;  %1668 = vmatprep.subr.mxu0 %v829_v52  ;;  %v1036_v35 = vld [vmem:[#allocation8 + $0x8f0] sm:$0xff]  ;;  %v1161_v36 = vld [vmem:[#allocation8 + $0xcd8] sm:$0xff] }
 0x17f   :  { %1739 = vmatprep.subr.mxu1 %v957_v8  ;;  %1669 = vmatpush2.msra.mxu0 %v828_v13  ;;  %v1164_v1 = vld [vmem:[#allocation8 + $0xcf0] sm:$0xff]  ;;  %v1029_v38 = vld [vmem:[#allocation8 + $0x8b8] sm:$0xff] }
 0x180   :  { %1740 = vmatpush2.msra.mxu1 %v956_v16  ;;  %1670 = vmatprep.subr.mxu0 %v825_v62  ;;  %v1032_v26 = vld [vmem:[#allocation8 + $0x8d0] sm:$0xff]  ;;  %v1157_v48 = vld [vmem:[#allocation8 + $0xcb8] sm:$0xff] }
 0x181   :  { %1741 = vmatprep.subr.mxu1 %v953_v58  ;;  %1671 = vmatpush2.msra.mxu0 %v824_v3  ;;  %v1160_v47 = vld [vmem:[#allocation8 + $0xcd0] sm:$0xff]  ;;  %v1025_v5 = vld [vmem:[#allocation8 + $0x898] sm:$0xff] }
 0x182   :  { %1742 = vmatpush2.msra.mxu1 %v952_v4  ;;  %1672 = vmatprep.subr.mxu0 %v821_v63  ;;  %v1028_v41 = vld [vmem:[#allocation8 + $0x8b0] sm:$0xff]  ;;  %v1153_v51 = vld [vmem:[#allocation8 + $0xc98] sm:$0xff] }
 0x183   :  { %1743 = vmatprep.subr.mxu1 %v949_v6  ;;  %1673 = vmatpush2.msra.mxu0 %v820_v7  ;;  %v1156_v50 = vld [vmem:[#allocation8 + $0xcb0] sm:$0xff]  ;;  %v1021_v13 = vld [vmem:[#allocation8 + $0x878] sm:$0xff] }
 0x184   :  { %1744 = vmatpush2.msra.mxu1 %v948_v9  ;;  %1674 = vmatprep.subr.mxu0 %v817_v25  ;;  %v1024_v52 = vld [vmem:[#allocation8 + $0x890] sm:$0xff]  ;;  %v1149_v16 = vld [vmem:[#allocation8 + $0xc78] sm:$0xff] }
 0x185   :  { %1745 = vmatprep.subr.mxu1 %v945_v29  ;;  %1675 = vmatpush2.msra.mxu0 %v816_v23  ;;  %v1152_v8 = vld [vmem:[#allocation8 + $0xc90] sm:$0xff]  ;;  %v1017_v3 = vld [vmem:[#allocation8 + $0x858] sm:$0xff] }
 0x186   :  { %1746 = vmatpush2.msra.mxu1 %v944_v30  ;;  %1677 = vmatmul.mubr.f32.vlgmr.msra.gmra.mxu0 %v2275_v49  ;;  %v1020_v62 = vld [vmem:[#allocation8 + $0x870] sm:$0xff]  ;;  %v1145_v4 = vld [vmem:[#allocation8 + $0xc58] sm:$0xff] }
 0x187   :  { %1748 = vmatmul.mubr.f32.vlgmr.msra.gmra.mxu1 %v2276_v37  ;;  %1754 = vmatprep.subr.mxu0 %v1069_v18  ;;  %v1148_v58 = vld [vmem:[#allocation8 + $0xc70] sm:$0xff]  ;;  %v1013_v7 = vld [vmem:[#allocation8 + $0x838] sm:$0xff] }
 0x188   :  { %1825 = vmatprep.subr.mxu1 %v1197_v32  ;;  %1755 = vmatpush1.msra.mxu0 %v1068_v33  ;;  %v1016_v63 = vld [vmem:[#allocation8 + $0x850] sm:$0xff]  ;;  %v1141_v9 = vld [vmem:[#allocation8 + $0xc38] sm:$0xff] }
 0x189   :  { %1818 = vmatprep.mubr.f32.mxu0 %v2848_v19  ;;  %1826 = vmatpush1.msra.mxu1 %v1196_v34  ;;  %v1053_v19 = vld [vmem:[#allocation8 + $0x978] sm:$0xff]  ;;  %v1144_v6 = vld [vmem:[#allocation8 + $0xc50] sm:$0xff] }
 0x18a   :  { %1889 = vmatprep.mubr.f32.mxu1 %v2855_v44  ;;  %1756 = vmatprep.subr.mxu0 %v1065_v39  ;;  %v1180_v44 = vld [vmem:[#allocation8 + $0xd70] sm:$0xff]  ;;  %v1009_v23 = vld [vmem:[#allocation8 + $0x818] sm:$0xff] }
 0x18b   :  { %1827 = vmatprep.subr.mxu1 %v1193_v28  ;;  %1757 = vmatpush1.msra.mxu0 %v1064_v61  ;;  %v1012_v25 = vld [vmem:[#allocation8 + $0x830] sm:$0xff]  ;;  %v1137_v30 = vld [vmem:[#allocation8 + $0xc18] sm:$0xff] }
 0x18c   :  { %1828 = vmatpush1.msra.mxu1 %v1192_v57  ;;  %1758 = vmatprep.subr.mxu0 %v1061_v42  ;;  %v1140_v29 = vld [vmem:[#allocation8 + $0xc30] sm:$0xff]  ;;  %v1133_v33 = vld [vmem:[#allocation8 + $0xbf8] sm:$0xff] }
 0x18d   :  { %1829 = vmatprep.subr.mxu1 %v1189_v43  ;;  %1759 = vmatpush1.msra.mxu0 %v1060_v40  ;;  %v1008_v18 = vld [vmem:[#allocation8 + $0x810] sm:$0xff]  ;;  %v1261_v49 = vld [vmem:[#allocation8 + $0xff8] sm:$0xff] }
 0x18e   :  { %1830 = vmatpush1.msra.mxu1 %v1188_v45  ;;  %1760 = vmatprep.subr.mxu0 %v1057_v2  ;;  %v1136_v32 = vld [vmem:[#allocation8 + $0xc10] sm:$0xff]  ;;  %v1129_v39 = vld [vmem:[#allocation8 + $0xbd8] sm:$0xff] }
 0x18f   :  { %1831 = vmatprep.subr.mxu1 %v1185_v12  ;;  %1761 = vmatpush1.msra.mxu0 %v1056_v46  ;;  %v1132_v34 = vld [vmem:[#allocation8 + $0xbf0] sm:$0xff]  ;;  %v1257_v28 = vld [vmem:[#allocation8 + $0xfd8] sm:$0xff] }
 0x190   :  { %1832 = vmatpush1.msra.mxu1 %v1184_v59  ;;  %1762 = vmatprep.subr.mxu0 %v1053_v19  ;;  %v1260_v37 = vld [vmem:[#allocation8 + $0xff0] sm:$0xff]  ;;  %v1125_v42 = vld [vmem:[#allocation8 + $0xbb8] sm:$0xff] }
 0x191   :  { %1833 = vmatprep.subr.mxu1 %v1181_v21  ;;  %1763 = vmatpush1.msra.mxu0 %v1052_v10  ;;  %v1128_v61 = vld [vmem:[#allocation8 + $0xbd0] sm:$0xff]  ;;  %v1253_v43 = vld [vmem:[#allocation8 + $0xfb8] sm:$0xff] }
 0x192   :  { %1834 = vmatpush1.msra.mxu1 %v1180_v44  ;;  %1764 = vmatprep.subr.mxu0 %v1049_v60  ;;  %v1256_v57 = vld [vmem:[#allocation8 + $0xfd0] sm:$0xff]  ;;  %v1121_v2 = vld [vmem:[#allocation8 + $0xb98] sm:$0xff] }
 0x193   :  { %1835 = vmatprep.subr.mxu1 %v1177_v0  ;;  %1765 = vmatpush1.msra.mxu0 %v1048_v11  ;;  %v1124_v40 = vld [vmem:[#allocation8 + $0xbb0] sm:$0xff]  ;;  %v1249_v12 = vld [vmem:[#allocation8 + $0xf98] sm:$0xff] }
 0x194   :  { %1836 = vmatpush1.msra.mxu1 %v1176_v24  ;;  %1766 = vmatprep.subr.mxu0 %v1045_v14  ;;  %v1252_v45 = vld [vmem:[#allocation8 + $0xfb0] sm:$0xff]  ;;  %v1117_v19 = vld [vmem:[#allocation8 + $0xb78] sm:$0xff] }
 0x195   :  { %1837 = vmatprep.subr.mxu1 %v1173_v15  ;;  %1767 = vmatpush1.msra.mxu0 %v1044_v53  ;;  %v1120_v46 = vld [vmem:[#allocation8 + $0xb90] sm:$0xff]  ;;  %v1245_v21 = vld [vmem:[#allocation8 + $0xf78] sm:$0xff] }
 0x196   :  { %1838 = vmatpush1.msra.mxu1 %v1172_v20  ;;  %1768 = vmatprep.subr.mxu0 %v1041_v54  ;;  %v1248_v59 = vld [vmem:[#allocation8 + $0xf90] sm:$0xff]  ;;  %v1113_v60 = vld [vmem:[#allocation8 + $0xb58] sm:$0xff] }
 0x197   :  { %1839 = vmatprep.subr.mxu1 %v1169_v27  ;;  %1769 = vmatpush1.msra.mxu0 %v1040_v31  ;;  %v1116_v10 = vld [vmem:[#allocation8 + $0xb70] sm:$0xff]  ;;  %v1241_v0 = vld [vmem:[#allocation8 + $0xf58] sm:$0xff] }
 0x198   :  { %1840 = vmatpush1.msra.mxu1 %v1168_v55  ;;  %1770 = vmatprep.subr.mxu0 %v1037_v22  ;;  %v1244_v44 = vld [vmem:[#allocation8 + $0xf70] sm:$0xff]  ;;  %v1109_v14 = vld [vmem:[#allocation8 + $0xb38] sm:$0xff] }
 0x199   :  { %1841 = vmatprep.subr.mxu1 %v1165_v56  ;;  %1771 = vmatpush1.msra.mxu0 %v1036_v35  ;;  %v1112_v11 = vld [vmem:[#allocation8 + $0xb50] sm:$0xff]  ;;  %v1237_v15 = vld [vmem:[#allocation8 + $0xf38] sm:$0xff] }
 0x19a   :  { %1842 = vmatpush1.msra.mxu1 %v1164_v1  ;;  %1772 = vmatprep.subr.mxu0 %v1033_v17  ;;  %v1240_v24 = vld [vmem:[#allocation8 + $0xf50] sm:$0xff]  ;;  %v1105_v54 = vld [vmem:[#allocation8 + $0xb18] sm:$0xff] }
 0x19b   :  { %1843 = vmatprep.subr.mxu1 %v1161_v36  ;;  %1773 = vmatpush1.msra.mxu0 %v1032_v26  ;;  %v1108_v53 = vld [vmem:[#allocation8 + $0xb30] sm:$0xff]  ;;  %v1233_v27 = vld [vmem:[#allocation8 + $0xf18] sm:$0xff] }
 0x19c   :  { %1844 = vmatpush1.msra.mxu1 %v1160_v47  ;;  %1774 = vmatprep.subr.mxu0 %v1029_v38  ;;  %v1236_v20 = vld [vmem:[#allocation8 + $0xf30] sm:$0xff]  ;;  %v1101_v22 = vld [vmem:[#allocation8 + $0xaf8] sm:$0xff] }
 0x19d   :  { %1845 = vmatprep.subr.mxu1 %v1157_v48  ;;  %1775 = vmatpush1.msra.mxu0 %v1028_v41  ;;  %v1104_v31 = vld [vmem:[#allocation8 + $0xb10] sm:$0xff]  ;;  %v1229_v56 = vld [vmem:[#allocation8 + $0xef8] sm:$0xff] }
 0x19e   :  { %1846 = vmatpush1.msra.mxu1 %v1156_v50  ;;  %1776 = vmatprep.subr.mxu0 %v1025_v5  ;;  %v1232_v55 = vld [vmem:[#allocation8 + $0xf10] sm:$0xff]  ;;  %v1097_v17 = vld [vmem:[#allocation8 + $0xad8] sm:$0xff] }
 0x19f   :  { %1847 = vmatprep.subr.mxu1 %v1153_v51  ;;  %1777 = vmatpush1.msra.mxu0 %v1024_v52  ;;  %v1100_v35 = vld [vmem:[#allocation8 + $0xaf0] sm:$0xff]  ;;  %v1225_v36 = vld [vmem:[#allocation8 + $0xed8] sm:$0xff] }
 0x1a0   :  { %1848 = vmatpush1.msra.mxu1 %v1152_v8  ;;  %1778 = vmatprep.subr.mxu0 %v1021_v13  ;;  %v1228_v1 = vld [vmem:[#allocation8 + $0xef0] sm:$0xff]  ;;  %v1093_v38 = vld [vmem:[#allocation8 + $0xab8] sm:$0xff] }
 0x1a1   :  { %1849 = vmatprep.subr.mxu1 %v1149_v16  ;;  %1779 = vmatpush1.msra.mxu0 %v1020_v62  ;;  %v1096_v26 = vld [vmem:[#allocation8 + $0xad0] sm:$0xff]  ;;  %v1221_v48 = vld [vmem:[#allocation8 + $0xeb8] sm:$0xff] }
 0x1a2   :  { %1850 = vmatpush1.msra.mxu1 %v1148_v58  ;;  %1780 = vmatprep.subr.mxu0 %v1017_v3  ;;  %v1224_v47 = vld [vmem:[#allocation8 + $0xed0] sm:$0xff]  ;;  %v1089_v5 = vld [vmem:[#allocation8 + $0xa98] sm:$0xff] }
 0x1a3   :  { %1851 = vmatprep.subr.mxu1 %v1145_v4  ;;  %1781 = vmatpush1.msra.mxu0 %v1016_v63  ;;  %v1092_v41 = vld [vmem:[#allocation8 + $0xab0] sm:$0xff]  ;;  %v1217_v51 = vld [vmem:[#allocation8 + $0xe98] sm:$0xff] }
 0x1a4   :  { %1852 = vmatpush1.msra.mxu1 %v1144_v6  ;;  %1782 = vmatprep.subr.mxu0 %v1013_v7  ;;  %v1220_v50 = vld [vmem:[#allocation8 + $0xeb0] sm:$0xff]  ;;  %v1085_v13 = vld [vmem:[#allocation8 + $0xa78] sm:$0xff] }
 0x1a5   :  { %1853 = vmatprep.subr.mxu1 %v1141_v9  ;;  %1783 = vmatpush1.msra.mxu0 %v1012_v25  ;;  %v1088_v52 = vld [vmem:[#allocation8 + $0xa90] sm:$0xff]  ;;  %v1213_v16 = vld [vmem:[#allocation8 + $0xe78] sm:$0xff] }
 0x1a6   :  { %1854 = vmatpush1.msra.mxu1 %v1140_v29  ;;  %1784 = vmatprep.subr.mxu0 %v1009_v23  ;;  %v1216_v8 = vld [vmem:[#allocation8 + $0xe90] sm:$0xff]  ;;  %v1081_v3 = vld [vmem:[#allocation8 + $0xa58] sm:$0xff] }
 0x1a7   :  { %1855 = vmatprep.subr.mxu1 %v1137_v30  ;;  %1785 = vmatpush1.msra.mxu0 %v1008_v18  ;;  %v1084_v62 = vld [vmem:[#allocation8 + $0xa70] sm:$0xff]  ;;  %v1209_v4 = vld [vmem:[#allocation8 + $0xe58] sm:$0xff] }
 0x1a8   :  { %1856 = vmatpush1.msra.mxu1 %v1136_v32  ;;  %1786 = vmatprep.subr.mxu0 %v1133_v33  ;;  %v1212_v58 = vld [vmem:[#allocation8 + $0xe70] sm:$0xff]  ;;  %v1077_v7 = vld [vmem:[#allocation8 + $0xa38] sm:$0xff]  ;;  %v1947_v33 = vld [vmem:[#allocation11 + $0xf8] sm:$0xff] }
 0x1a9   :  { %1857 = vmatprep.subr.mxu1 %v1261_v49  ;;  %1787 = vmatpush2.msra.mxu0 %v1132_v34  ;;  %v1080_v63 = vld [vmem:[#allocation8 + $0xa50] sm:$0xff]  ;;  %v1205_v9 = vld [vmem:[#allocation8 + $0xe38] sm:$0xff]  ;;  %v1931_v49 = vld [vmem:[#allocation11 + $0x78] sm:$0xff] }
 0x1aa   :  { %1858 = vmatpush2.msra.mxu1 %v1260_v37  ;;  %1788 = vmatprep.subr.mxu0 %v1129_v39  ;;  %v1208_v6 = vld [vmem:[#allocation8 + $0xe50] sm:$0xff]  ;;  %v1073_v23 = vld [vmem:[#allocation8 + $0xa18] sm:$0xff]  ;;  %v2278_v39 = vld [vmem:[#allocation2 + $0x8] sm:$0xff] }
 0x1ab   :  { %1859 = vmatprep.subr.mxu1 %v1257_v28  ;;  %1789 = vmatpush2.msra.mxu0 %v1128_v61  ;;  %v1076_v25 = vld [vmem:[#allocation8 + $0xa30] sm:$0xff]  ;;  %v1201_v30 = vld [vmem:[#allocation8 + $0xe18] sm:$0xff] }
 0x1ac   :  { %1860 = vmatpush2.msra.mxu1 %v1256_v57  ;;  %1790 = vmatprep.subr.mxu0 %v1125_v42  ;;  %v1204_v29 = vld [vmem:[#allocation8 + $0xe30] sm:$0xff]  ;;  %v2277_v34 = vld [vmem:[#allocation2 + $0x18] sm:$0xff]  ;;  %v1979_v42 = vld [vmem:[#allocation11 + $0x1f8] sm:$0xff] }
 0x1ad   :  { %1861 = vmatprep.subr.mxu1 %v1253_v43  ;;  %1791 = vmatpush2.msra.mxu0 %v1124_v40  ;;  %v1072_v18 = vld [vmem:[#allocation8 + $0xa10] sm:$0xff]  ;;  %v1946_v37 = vld [vmem:[#allocation11 + $0xf0] sm:$0xff]  ;;  %v1963_v43 = vld [vmem:[#allocation11 + $0x178] sm:$0xff] }
 0x1ae   :  { %1862 = vmatpush2.msra.mxu1 %v1252_v45  ;;  %1792 = vmatprep.subr.mxu0 %v1121_v2  ;;  %v1200_v32 = vld [vmem:[#allocation8 + $0xe10] sm:$0xff]  ;;  %v1930_v28 = vld [vmem:[#allocation11 + $0x70] sm:$0xff]  ;;  %v1944_v45 = vld [vmem:[#allocation11 + $0xe0] sm:$0xff] }
 0x1af   :  { %1863 = vmatprep.subr.mxu1 %v1249_v12  ;;  %1793 = vmatpush2.msra.mxu0 %v1120_v46  ;;  %v1945_v61 = vld [vmem:[#allocation11 + $0xe8] sm:$0xff]  ;;  %v1978_v40 = vld [vmem:[#allocation11 + $0x1f0] sm:$0xff]  ;;  %v1928_v12 = vld [vmem:[#allocation11 + $0x60] sm:$0xff] }
 0x1b0   :  { %1864 = vmatpush2.msra.mxu1 %v1248_v59  ;;  %1794 = vmatprep.subr.mxu0 %v1117_v19  ;;  %v1929_v57 = vld [vmem:[#allocation11 + $0x68] sm:$0xff]  ;;  %v1962_v2 = vld [vmem:[#allocation11 + $0x170] sm:$0xff]  ;;  %v1943_v46 = vld [vmem:[#allocation11 + $0xd8] sm:$0xff] }
 0x1b1   :  { %1865 = vmatprep.subr.mxu1 %v1245_v21  ;;  %1795 = vmatpush2.msra.mxu0 %v1116_v10  ;;  %v1927_v59 = vld [vmem:[#allocation11 + $0x58] sm:$0xff]  ;;  %v1942_v19 = vld [vmem:[#allocation11 + $0xd0] sm:$0xff]  ;;  %v1941_v10 = vld [vmem:[#allocation11 + $0xc8] sm:$0xff] }
 0x1b2   :  { %1866 = vmatpush2.msra.mxu1 %v1244_v44  ;;  %1796 = vmatprep.subr.mxu0 %v1113_v60  ;;  %v1926_v21 = vld [vmem:[#allocation11 + $0x50] sm:$0xff]  ;;  %v1925_v44 = vld [vmem:[#allocation11 + $0x48] sm:$0xff]  ;;  %v1940_v60 = vld [vmem:[#allocation11 + $0xc0] sm:$0xff] }
 0x1b3   :  { %1867 = vmatprep.subr.mxu1 %v1241_v0  ;;  %1797 = vmatpush2.msra.mxu0 %v1112_v11  ;;  %v1924_v0 = vld [vmem:[#allocation11 + $0x40] sm:$0xff]  ;;  %v1939_v11 = vld [vmem:[#allocation11 + $0xb8] sm:$0xff] }
 0x1b4   :  { %1868 = vmatpush2.msra.mxu1 %v1240_v24  ;;  %1798 = vmatprep.subr.mxu0 %v1109_v14  ;;  %v1923_v24 = vld [vmem:[#allocation11 + $0x38] sm:$0xff]  ;;  %v1938_v14 = vld [vmem:[#allocation11 + $0xb0] sm:$0xff] }
 0x1b5   :  { %1869 = vmatprep.subr.mxu1 %v1237_v15  ;;  %1799 = vmatpush2.msra.mxu0 %v1108_v53  ;;  %v1922_v15 = vld [vmem:[#allocation11 + $0x30] sm:$0xff]  ;;  %v1937_v53 = vld [vmem:[#allocation11 + $0xa8] sm:$0xff] }
 0x1b6   :  { %1870 = vmatpush2.msra.mxu1 %v1236_v20  ;;  %1800 = vmatprep.subr.mxu0 %v1105_v54  ;;  %v1921_v20 = vld [vmem:[#allocation11 + $0x28] sm:$0xff]  ;;  %v1936_v54 = vld [vmem:[#allocation11 + $0xa0] sm:$0xff] }
 0x1b7   :  { %1871 = vmatprep.subr.mxu1 %v1233_v27  ;;  %1801 = vmatpush2.msra.mxu0 %v1104_v31  ;;  %v1920_v27 = vld [vmem:[#allocation11 + $0x20] sm:$0xff]  ;;  %v1935_v31 = vld [vmem:[#allocation11 + $0x98] sm:$0xff] }
 0x1b8   :  { %1872 = vmatpush2.msra.mxu1 %v1232_v55  ;;  %1802 = vmatprep.subr.mxu0 %v1101_v22  ;;  %v1919_v55 = vld [vmem:[#allocation11 + $0x18] sm:$0xff]  ;;  %v1934_v22 = vld [vmem:[#allocation11 + $0x90] sm:$0xff] }
 0x1b9   :  { %1873 = vmatprep.subr.mxu1 %v1229_v56  ;;  %1803 = vmatpush2.msra.mxu0 %v1100_v35  ;;  %v1918_v56 = vld [vmem:[#allocation11 + $0x10] sm:$0xff]  ;;  %v1933_v35 = vld [vmem:[#allocation11 + $0x88] sm:$0xff] }
 0x1ba   :  { %1874 = vmatpush2.msra.mxu1 %v1228_v1  ;;  %1804 = vmatprep.subr.mxu0 %v1097_v17  ;;  %v1917_v1 = vld [vmem:[#allocation11 + $0x8] sm:$0xff]  ;;  %v1932_v17 = vld [vmem:[#allocation11 + $0x80] sm:$0xff] }
 0x1bb   :  { %1875 = vmatprep.subr.mxu1 %v1225_v36  ;;  %1805 = vmatpush2.msra.mxu0 %v1096_v26  ;;  %v1916_v36 = vld [vmem:[#allocation11] sm:$0xff]  ;;  %v2864_v26 = vld [vmem:[#allocation9] ss:$2 sm:$0xf] }
 0x1bc   :  { %1876 = vmatpush2.msra.mxu1 %v1224_v47  ;;  %1806 = vmatprep.subr.mxu0 %v1093_v38  ;;  %v2866_v47 = vld [vmem:[#allocation9 + $0x1] ss:$2 sm:$0xf]  ;;  %v2927_v38 = vld [vmem:[#allocation20_spill] sm:$0xff] }
 0x1bd   :  { %1877 = vmatprep.subr.mxu1 %v1221_v48  ;;  %1807 = vmatpush2.msra.mxu0 %v1092_v41  ;;  %v1274_v48 = vrot.slane %v2864_v26, %v2927_v38  ;;  %v1295_v41 = vrot.slane %v2866_v47, %v2927_v38  ;;  %v1948_v38 = vld [vmem:[#allocation11 + $0x100] sm:$0xff] }
 0x1be   :  { %1878 = vmatpush2.msra.mxu1 %v1220_v50  ;;  %1808 = vmatprep.subr.mxu0 %v1089_v5  ;;  %v2928_v50 = vld [vmem:[#allocation19_spill] sm:$0xff] }
 0x1bf   :  { %1879 = vmatprep.subr.mxu1 %v1217_v51  ;;  %1809 = vmatpush2.msra.mxu0 %v1088_v52  ;;  %vm1264_vm1 = vcmp.lt.s32.totalorder %v2928_v50, 2  ;;  %v2929_v51 = vld [vmem:[#allocation21_spill] sm:$0xff] }
 0x1c0   :  { %1880 = vmatpush2.msra.mxu1 %v1216_v8  ;;  %1810 = vmatprep.subr.mxu0 %v1085_v13  ;;  %v1278_v52 = vrot.slane %v2864_v26, %v2929_v51  ;;  %v1299_v8 = vrot.slane %v2866_v47, %v2929_v51  ;;  %v1312_v13 = vsel %vm1264_vm1, %v1274_v48, %v1295_v41  ;;  %v1285_v48 = vsub.s32 3, %v2928_v50  ;;  %v2930_v41 = vld [vmem:[#allocation22_spill] sm:$0xff] }
 0x1c1   :  { %1881 = vmatprep.subr.mxu1 %v1213_v16  ;;  %1811 = vmatpush2.msra.mxu0 %v1084_v62  ;;  %v1303_v51 = vrot.slane %v2866_v47, %v2930_v41 }
 0x1c2   :  { %1882 = vmatpush2.msra.mxu1 %v1212_v58  ;;  %1812 = vmatprep.subr.mxu0 %v1081_v3  ;;  %v1394_v5 = vpop.f32.mrf.mxu0  ;;  %v1313_v16 = vsel %vm1264_vm1, %v1278_v52, %v1299_v8  ;;  %v1286_v8 = vrot.slane %v2864_v26, %v1285_v48 }
 0x1c3   :  { %1883 = vmatprep.subr.mxu1 %v1209_v4  ;;  %1813 = vmatpush2.msra.mxu0 %v1080_v63  ;;  %v1395_v58 = vadd.f32 %v1394_v5, %v1312_v13  ;;  %v1282_v5 = vrot.slane %v2864_v26, %v2930_v41  ;;  %v1307_v13 = vrot.slane %v2866_v47, %v1285_v48 }
 0x1c4   :  { %1884 = vmatpush2.msra.mxu1 %v1208_v6  ;;  %1814 = vmatprep.subr.mxu0 %v1077_v7  ;;  %v1396_v62 = vpop.f32.mrf.mxu0 }
 0x1c5   :  { %1885 = vmatprep.subr.mxu1 %v1205_v9  ;;  %1815 = vmatpush2.msra.mxu0 %v1076_v25  ;;  %v1465_v3 = vpop.f32.mrf.mxu1  ;;  %v1397_v4 = vadd.f32 %v1396_v62, %v1313_v16  ;;  %v1314_v16 = vsel %vm1264_vm1, %v1282_v5, %v1303_v51  ;;  %v1315_v62 = vsel %vm1264_vm1, %v1286_v8, %v1307_v13 }
 0x1c6   :  { %1886 = vmatpush2.msra.mxu1 %v1204_v29  ;;  %1816 = vmatprep.subr.mxu0 %v1073_v23  ;;  %v1466_v63 = vadd.f32 %v1465_v3, %v1395_v58 }
 0x1c7   :  { %1887 = vmatprep.subr.mxu1 %v1201_v30  ;;  %1817 = vmatpush2.msra.mxu0 %v1072_v18  ;;  %v1467_v6 = vpop.f32.mrf.mxu1 }
 0x1c8   :  { %1888 = vmatpush2.msra.mxu1 %v1200_v32  ;;  %1819 = vmatmul.mubr.f32.vlgmr.msra.gmra.mxu0 %v2277_v34  ;;  %v1468_v9 = vadd.f32 %v1467_v6, %v1397_v4 }
 0x1c9   :  { %1890 = vmatmul.mubr.f32.vlgmr.msra.gmra.mxu1 %v2278_v39  ;;  %2176 = vmatprep.subr.mxu0 %v1947_v33  ;;  %v1961_v39 = vld [vmem:[#allocation11 + $0x168] sm:$0xff] }
 0x1ca   :  { %2177 = vmatpush3.msra.mxu0 %v1931_v49  ;;  %2211 = vmatprep.subr.mxu1 %v1979_v42  ;;  %v1959_v42 = vld [vmem:[#allocation11 + $0x158] sm:$0xff] }
 0x1cb   :  { %2178 = vmatprep.subr.mxu0 %v1946_v37  ;;  %2212 = vmatpush3.msra.mxu1 %v1963_v43  ;;  %v1977_v37 = vld [vmem:[#allocation11 + $0x1e8] sm:$0xff]  ;;  %v1974_v43 = vld [vmem:[#allocation11 + $0x1d0] sm:$0xff] }
 0x1cc   :  { %2179 = vmatpush3.msra.mxu0 %v1930_v28  ;;  %2213 = vmatprep.subr.mxu1 %v1978_v40  ;;  %v1976_v28 = vld [vmem:[#allocation11 + $0x1e0] sm:$0xff] }
 0x1cd   :  { %2180 = vmatprep.subr.mxu0 %v1945_v61  ;;  %2214 = vmatpush3.msra.mxu1 %v1962_v2  ;;  %v1960_v61 = vld [vmem:[#allocation11 + $0x160] sm:$0xff]  ;;  %v1973_v2 = vld [vmem:[#allocation11 + $0x1c8] sm:$0xff] }
 0x1ce   :  { %2181 = vmatpush3.msra.mxu0 %v1929_v57  ;;  %2215 = vmatprep.subr.mxu1 %v1977_v37  ;;  %v1975_v57 = vld [vmem:[#allocation11 + $0x1d8] sm:$0xff] }
 0x1cf   :  { %2182 = vmatprep.subr.mxu0 %v1944_v45  ;;  %2216 = vmatpush3.msra.mxu1 %v1961_v39  ;;  %v1958_v45 = vld [vmem:[#allocation11 + $0x150] sm:$0xff] }
 0x1d0   :  { %2183 = vmatpush3.msra.mxu0 %v1928_v12  ;;  %2217 = vmatprep.subr.mxu1 %v1976_v28 }
 0x1d1   :  { %2184 = vmatprep.subr.mxu0 %v1943_v46  ;;  %2218 = vmatpush3.msra.mxu1 %v1960_v61 }
 0x1d2   :  { %2185 = vmatpush3.msra.mxu0 %v1927_v59  ;;  %2219 = vmatprep.subr.mxu1 %v1975_v57  ;;  %v1957_v59 = vld [vmem:[#allocation11 + $0x148] sm:$0xff] }
 0x1d3   :  { %2186 = vmatprep.subr.mxu0 %v1942_v19  ;;  %2220 = vmatpush3.msra.mxu1 %v1959_v42 }
 0x1d4   :  { %2187 = vmatpush3.msra.mxu0 %v1926_v21  ;;  %2221 = vmatprep.subr.mxu1 %v1974_v43 }
 0x1d5   :  { %2188 = vmatprep.subr.mxu0 %v1941_v10  ;;  %2222 = vmatpush3.msra.mxu1 %v1958_v45  ;;  %v1972_v10 = vld [vmem:[#allocation11 + $0x1c0] sm:$0xff] }
 0x1d6   :  { %2189 = vmatpush3.msra.mxu0 %v1925_v44  ;;  %2223 = vmatprep.subr.mxu1 %v1973_v2  ;;  %v2172_v2 = vld [vmem:[#allocation12] ss:$0 sm:$0xff] }
 0x1d7   :  { %2190 = vmatprep.subr.mxu0 %v1940_v60  ;;  %2224 = vmatpush3.msra.mxu1 %v1957_v59  ;;  %v1956_v60 = vld [vmem:[#allocation11 + $0x140] sm:$0xff] }
 0x1d8   :  { %2191 = vmatpush3.msra.mxu0 %v1924_v0  ;;  %2225 = vmatprep.subr.mxu1 %v1972_v10 }
 0x1d9   :  { %2192 = vmatprep.subr.mxu0 %v1939_v11  ;;  %2226 = vmatpush3.msra.mxu1 %v1956_v60  ;;  %v1971_v11 = vld [vmem:[#allocation11 + $0x1b8] sm:$0xff] }
 0x1da   :  { %2193 = vmatpush3.msra.mxu0 %v1923_v24  ;;  %2227 = vmatprep.subr.mxu1 %v1971_v11  ;;  %v2174_v11 = vld [vmem:[#allocation14 + $0x1] ss:$0 sm:$0xff] }
 0x1db   :  { %2194 = vmatprep.subr.mxu0 %v1938_v14  ;;  %v1955_v14 = vld [vmem:[#allocation11 + $0x138] sm:$0xff] }
 0x1dc   :  { %2195 = vmatpush3.msra.mxu0 %v1922_v15  ;;  %2228 = vmatpush3.msra.mxu1 %v1955_v14  ;;  %v1970_v15 = vld [vmem:[#allocation11 + $0x1b0] sm:$0xff]  ;;  %v2173_v14 = vld [vmem:[#allocation14] ss:$0 sm:$0xff] }
 0x1dd   :  { %2196 = vmatprep.subr.mxu0 %v1937_v53  ;;  %v1954_v53 = vld [vmem:[#allocation11 + $0x130] sm:$0xff]  ;;  %2229 = vmatprep.subr.mxu1 %v1970_v15 }
 0x1de   :  { %2197 = vmatpush3.msra.mxu0 %v1921_v20  ;;  %v1969_v20 = vld [vmem:[#allocation11 + $0x1a8] sm:$0xff]  ;;  %2230 = vmatpush3.msra.mxu1 %v1954_v53 }
 0x1df   :  { %2198 = vmatprep.subr.mxu0 %v1936_v54  ;;  %v1953_v54 = vld [vmem:[#allocation11 + $0x128] sm:$0xff]  ;;  %2231 = vmatprep.subr.mxu1 %v1969_v20 }
 0x1e0   :  { %2199 = vmatpush3.msra.mxu0 %v1920_v27  ;;  %v1968_v27 = vld [vmem:[#allocation11 + $0x1a0] sm:$0xff]  ;;  %2232 = vmatpush3.msra.mxu1 %v1953_v54 }
 0x1e1   :  { %2200 = vmatprep.subr.mxu0 %v1935_v31  ;;  %v1952_v31 = vld [vmem:[#allocation11 + $0x120] sm:$0xff]  ;;  %2233 = vmatprep.subr.mxu1 %v1968_v27 }
 0x1e2   :  { %2201 = vmatpush3.msra.mxu0 %v1919_v55  ;;  %v1967_v55 = vld [vmem:[#allocation11 + $0x198] sm:$0xff]  ;;  %2234 = vmatpush3.msra.mxu1 %v1952_v31  ;;  %v2152_v31 = vstv %s2907_s8 }
 0x1e3   :  { %2202 = vmatprep.subr.mxu0 %v1934_v22  ;;  %v1951_v22 = vld [vmem:[#allocation11 + $0x118] sm:$0xff]  ;;  %2235 = vmatprep.subr.mxu1 %v1967_v55 }
 0x1e4   :  { %2203 = vmatpush3.msra.mxu0 %v1918_v56  ;;  %v1966_v56 = vld [vmem:[#allocation11 + $0x190] sm:$0xff]  ;;  %2236 = vmatpush3.msra.mxu1 %v1951_v22 }
 0x1e5   :  { %2204 = vmatprep.subr.mxu0 %v1933_v35  ;;  %v1950_v35 = vld [vmem:[#allocation11 + $0x110] sm:$0xff]  ;;  %2237 = vmatprep.subr.mxu1 %v1966_v56 }
 0x1e6   :  { %2205 = vmatpush3.msra.mxu0 %v1917_v1  ;;  %v1965_v1 = vld [vmem:[#allocation11 + $0x188] sm:$0xff]  ;;  %2238 = vmatpush3.msra.mxu1 %v1950_v35 }
 0x1e7   :  { %2206 = vmatprep.subr.mxu0 %v1932_v17  ;;  %v1949_v17 = vld [vmem:[#allocation11 + $0x108] sm:$0xff]  ;;  %2239 = vmatprep.subr.mxu1 %v1965_v1 }
 0x1e8   :  { %2207 = vmatpush3.msra.mxu0 %v1916_v36  ;;  %v1964_v36 = vld [vmem:[#allocation11 + $0x180] sm:$0xff]  ;;  %2240 = vmatpush3.msra.mxu1 %v1949_v17 }
 0x1e9   :  { %2241 = vmatprep.subr.mxu1 %v1964_v36 }
 0x1ea   :  { %2242 = vmatpush3.msra.mxu1 %v1948_v38 }
 0x204   :  { %v1536_v7 = vpop.f32.mrf.mxu0 }
 0x205   :  { %v1537_v25 = vadd.f32 %v1536_v7, %v1466_v63  ;;  %v1607_v29 = vpop.f32.mrf.mxu1 }
 0x206   :  { %v1538_v23 = vpop.f32.mrf.mxu0 }
 0x207   :  { %v1608_v30 = vadd.f32 %v1607_v29, %v1537_v25  ;;  %v1539_v18 = vadd.f32 %v1538_v23, %v1468_v9  ;;  %v1609_v32 = vpop.f32.mrf.mxu1 }
 0x209   :  { %v1900_v33 = vmul.f32 0.70710677, %v1608_v30  ;;  %v1610_v49 = vadd.f32 %v1609_v32, %v1539_v18  ;;  %v1896_v44 = vmul.f32 0.5, %v1608_v30 }
 0x20b   :  { %2261 = verf.f32 %v1900_v33  ;;  %v1901_v34 = vmul.f32 0.70710677, %v1610_v49  ;;  %v1897_v19 = vmul.f32 0.5, %v1610_v49 }
 0x20d   :  { %2263 = verf.f32 %v1901_v34 }
 0x218   :  { %v2262_v40 = vpop.eup %2261 }
 0x219   :  { %v1908_v46 = vadd.f32 1.0, %v2262_v40 }
 0x21a   :  { %v2264_v12 = vpop.eup %2263 }
 0x21b   :  { %v1909_v21 = vadd.f32 1.0, %v2264_v12  ;;  %v1912_v24 = vmul.f32 %v1908_v46, %v1896_v44 }
 0x21d   :  { %v1913_v0 = vmul.f32 %v1909_v21, %v1897_v19 }
 0x21f   :  { %2051 = vmatprep.mubr.f32.mxu0 %v1913_v0 }
 0x220   :  { %2052 = vmatmul.mubr.f32.vlgmr.msra.gmra.mxu0 %v1912_v24 }
 0x246   :  { %v1678_v52 = vpop.f32.mrf.mxu0 }
 0x247   :  { %v1679_v3 = vadd.f32 %v1678_v52, %v1314_v16  ;;  %v1749_v4 = vpop.f32.mrf.mxu1 }
 0x248   :  { %v1680_v58 = vpop.f32.mrf.mxu0 }
 0x249   :  { %v1681_v63 = vadd.f32 %v1680_v58, %v1315_v62  ;;  %v1750_v6 = vadd.f32 %v1749_v4, %v1679_v3  ;;  %v1751_v7 = vpop.f32.mrf.mxu1 }
 0x24b   :  { %v1752_v25 = vadd.f32 %v1751_v7, %v1681_v63 }
 0x288   :  { %v1820_v9 = vpop.f32.mrf.mxu0 }
 0x289   :  { %v1821_v29 = vadd.f32 %v1820_v9, %v1750_v6  ;;  %v1891_v23 = vpop.f32.mrf.mxu1 }
 0x28a   :  { %v1822_v30 = vpop.f32.mrf.mxu0 }
 0x28b   :  { %v1892_v26 = vadd.f32 %v1891_v23, %v1821_v29  ;;  %v1823_v18 = vadd.f32 %v1822_v30, %v1752_v25  ;;  %v1893_v47 = vpop.f32.mrf.mxu1 }
 0x28d   :  { %v1902_v32 = vmul.f32 0.70710677, %v1892_v26  ;;  %v1894_v33 = vadd.f32 %v1893_v47, %v1823_v18  ;;  %v1898_v61 = vmul.f32 0.5, %v1892_v26 }
 0x28f   :  { %2265 = verf.f32 %v1902_v32  ;;  %v1903_v49 = vmul.f32 0.70710677, %v1894_v33  ;;  %v1899_v39 = vmul.f32 0.5, %v1894_v33 }
 0x291   :  { %2267 = verf.f32 %v1903_v49 }
 0x29c   :  { %v2266_v50 = vpop.eup %2265 }
 0x29d   :  { %v1910_v37 = vadd.f32 1.0, %v2266_v50 }
 0x29e   :  { %v2268_v34 = vpop.eup %2267 }
 0x29f   :  { %v1911_v28 = vadd.f32 1.0, %v2268_v34  ;;  %v1914_v42 = vmul.f32 %v1910_v37, %v1898_v61 }
 0x2a1   :  { %v1915_v57 = vmul.f32 %v1911_v28, %v1899_v39 }
 0x2a3   :  { %2121 = vmatprep.mubr.f32.mxu1 %v1915_v57 }
 0x2a4   :  { %2122 = vmatmul.mubr.f32.vlgmr.msra.gmra.mxu1 %v1914_v42 }
 0x2e0   :  { %v2208_v43 = vpop.f32.mrf.mxu0 }
 0x2e2   :  { %v2209_v40 = vpop.f32.mrf.mxu0 }
 0x2e3   :  { %v2210_v45 = vadd.f32 %v2209_v40, %v2208_v43 }
 0x2e5   :  { %v2054_v59 = vadd.f32 %v2210_v45, %v2172_v2 }
 0x364   :  { %v2243_v12 = vpop.f32.mrf.mxu1 }
 0x366   :  { %v2244_v46 = vpop.f32.mrf.mxu1 }
 0x367   :  { %v2245_v19 = vadd.f32 %v2244_v46, %v2243_v12 }
 0x369   :  { %v2124_v21 = vadd.f32 %v2245_v19, %v2054_v59 }
 0x36b   :  { %v2128_v10 = vmul.f32 0.70710677, %v2124_v21  ;;  %v2127_v60 = vmul.f32 0.5, %v2124_v21 }
 0x36d   :  { %2269 = verf.f32 %v2128_v10 }
 0x37a   :  { %v2270_v44 = vpop.eup %2269 }
 0x37b   :  { %v2130_v0 = vadd.f32 1.0, %v2270_v44 }
 0x37d   :  { %v2131_v24 = vmul.f32 %v2130_v0, %v2127_v60 }
 0x37f   :  { %v2143_v15 = vmul.f32 %v2174_v11, %v2131_v24  ;;  %v2137_v53 = vmul.f32 %v2173_v14, %v2131_v24 }
 0x381   :  { %v2145_v20 = vrot.slane %v2143_v15, 2 }
 0x383   :  { %v2147_v54 = vadd.f32 %v2145_v20, %v2137_v53 }
 0x385   :  { %v2148_v27 = vsel %vm138_vm0, %v2147_v54, 0.0 }
 0x386   :  { %2149 = vadd.xlane.f32.xlu1 %v2148_v27 }
 0x40f   :  { %v2150_v55 = vpop.xlane.xlu1 %2149 }
 0x410   :  { %v2153_v22 = vadd.f32 %v2152_v31, %v2150_v55 }
 0x412   :  { %v2175_v56 = vmul.f32 -1.442695, %v2153_v22 }
 0x414   :  { %2271 = vpow2.f32 %v2175_v56 }
 0x421   :  { %v2272_v35 = vpop.eup %2271 }
 0x422   :  { %v2157_v1 = vadd.f32 1.0, %v2272_v35 }
 0x424   :  { %2273 = vrcp.f32 %v2157_v1 }
 0x431   :  { %v2274_v17 = vpop.eup %2273 }
 0x432   :  { %2160 = vst [vmem:[%s2908_s9] sm:$0x3] %v2274_v17 }
 0x433   :  { %2165 = vsyncpa [#allocation5], 1 }
 0x434   :  { %2166 = vsyncpa [#allocation7], 1 }
 0x435   :  { %2167 = vsyncpa [#allocation10], 1 }
 0x436   :  { %2168 = vsyncpa [#allocation13], 1 }

</bundles_post_ra>
